<compile_context>
chip_gen: v5e
topology: v5e:2x2
jax: 0.10.0
libtpu: 0.0.40
codegen_flags: <defaults>
</compile_context>

<pallas_src>
import jax
import jax.numpy as jnp
from jax import lax
from jax.experimental import pallas as pl
from jax.experimental.pallas import tpu as pltpu

K = 7
PAD = 3


def _round_up(x, m):
    return (x + m - 1) // m * m


def spatial_attn_kernel(x_ref, w_ref, b_ref, o_ref, xpad_ref):
    # x_ref:    (C, H, W)        one NCHW image (batch dim squeezed)
    # w_ref:    SMEM (C*49,) f32 conv weights, flattened (c, kh, kw)
    # b_ref:    SMEM (1,) f32    conv bias (single output channel)
    # o_ref:    (C, H, W)        output image
    # xpad_ref: VMEM (HP, WP)    per-channel plane; data at [0:H,0:W], zero margin after
    C, H, W = x_ref.shape
    HP, WP = xpad_ref.shape

    # Zero only the trailing margin (rows >= H, cols >= W); it is never overwritten by
    # the per-channel fill and serves both as the +3 conv halo and as the landing zone
    # for pltpu.roll wrap-around, so valid outputs never see wrapped data.
    xpad_ref[H:, :] = jnp.zeros((HP - H, WP), xpad_ref.dtype)
    xpad_ref[:H, W:] = jnp.zeros((H, WP - W), xpad_ref.dtype)

    # 7x7 conv as 49*C splat-FMAs on the padded plane. Each channel is loaded once; tap
    # offsets (kh-3, kw-3) are realized with static rolls: sublane rolls for kh, lane
    # rolls for kw (both XLU, overlapping with the VPU FMA work).
    def chan_body(c, acc):
        xpad_ref[:H, :W] = x_ref[c].astype(xpad_ref.dtype)   # aligned (0,0) store
        xp = xpad_ref[...].astype(jnp.float32)               # single load + cast / channel
        for kh in range(K):
            sh = (PAD - kh) % HP
            xh = pltpu.roll(xp, shift=sh, axis=0) if sh else xp
            for kw in range(K):
                sw = (PAD - kw) % WP
                xhw = pltpu.roll(xh, shift=sw, axis=1) if sw else xh
                acc = acc + xhw * w_ref[c * (K * K) + kh * K + kw]   # scalar from SMEM
        return acc

    acc0 = jnp.zeros((HP, WP), jnp.float32) + b_ref[0]       # bias folded into init
    acc = lax.fori_loop(0, C, chan_body, acc0)

    attn = jax.nn.sigmoid(acc[:H, :W])                        # (H, W); EUP transcendental
    o_ref[...] = (x_ref[...].astype(jnp.float32) * attn[None, :, :]).astype(o_ref.dtype)


def spatial_attention(x_nchw, weight_oihw, bias):
    """x_nchw: (B, C, H, W); weight_oihw: (1, C, 7, 7); bias: (1,). Returns NCHW."""
    B, C, H, W = x_nchw.shape

    # Scratch plane padded to native (8, 128) vreg tiles; data at [0:H,0:W], trailing
    # zero margin (>= 3 rows / cols) is the halo + roll wrap zone.
    HP = _round_up(H + PAD, 8)
    WP = _round_up(W + PAD, 128)
    scratch_dtype = x_nchw.dtype if x_nchw.dtype == jnp.bfloat16 else jnp.float32

    w_flat = weight_oihw.reshape(C * K * K).astype(jnp.float32)
    b_flat = bias.reshape((1,)).astype(jnp.float32)

    # Scoped-VMEM budget: 2x double-buffered in block + 2x out block + scratch + slack,
    # capped under physical VMEM (48 MiB-equivalent on v7x, ~96 MiB on v5e/v6e).
    item = jnp.dtype(x_nchw.dtype).itemsize
    block_bytes = C * H * W * item
    scratch_bytes = HP * WP * jnp.dtype(scratch_dtype).itemsize
    needed = 4 * block_bytes + scratch_bytes + (2 << 20)
    try:
        phys = pltpu.get_tpu_info().vmem_capacity_bytes
    except Exception:
        phys = 64 << 20
    vmem_limit = int(min(max(needed * 5 // 4, 32 << 20), phys * 3 // 4))

    # TODO(synk): when W < 128 only W/128 of each vreg's lanes are used (layout is only
    # fully efficient for W a multiple of 128) — pack rows/images into the lane dim in
    # the wrapper for small-W CBAM shapes. For very large H*C on v7x (64 MiB VMEM),
    # additionally tile H into halo'd row strips as a second parallel grid axis.
    return pl.pallas_call(
        spatial_attn_kernel,
        out_shape=jax.ShapeDtypeStruct((B, C, H, W), x_nchw.dtype),
        grid=(B,),
        in_specs=[
            pl.BlockSpec((None, C, H, W), lambda i: (i, 0, 0, 0)),
            pl.BlockSpec(memory_space=pltpu.MemorySpace.SMEM),
            pl.BlockSpec(memory_space=pltpu.MemorySpace.SMEM),
        ],
        out_specs=pl.BlockSpec((None, C, H, W), lambda i: (i, 0, 0, 0)),
        scratch_shapes=[pltpu.VMEM((HP, WP), scratch_dtype)],
        compiler_params=pltpu.CompilerParams(
            dimension_semantics=("parallel",),
            vmem_limit_bytes=vmem_limit,
        ),
    )(x_nchw, w_flat, b_flat)


if __name__ == "__main__":
    key = jax.random.PRNGKey(0)
    kx, kw_, kb = jax.random.split(key, 3)

    B, C, H, W = 2, 4, 16, 16
    x = jax.random.normal(kx, (B, C, H, W), dtype=jnp.float32)
    # Deterministic synthetic parameters (Conv2d(C, 1, 7, padding=3) shapes).
    weight = jax.random.normal(kw_, (1, C, K, K), dtype=jnp.float32) * 0.05
    bias = jax.random.normal(kb, (1,), dtype=jnp.float32) * 0.05

    out = jax.block_until_ready(spatial_attention(x, weight, bias))

    # Pure-JAX reference for sanity checking.
    conv = lax.conv_general_dilated(
        x, weight, window_strides=(1, 1), padding=[(PAD, PAD), (PAD, PAD)],
        dimension_numbers=("NCHW", "OIHW", "NCHW"))
    ref = x * jax.nn.sigmoid(conv + bias.reshape(1, 1, 1, 1))

    assert out.shape == (B, C, H, W)
    assert jnp.allclose(out, ref, rtol=1e-5, atol=1e-5), "mismatch vs reference"
    print("KERNEL_OK")
</pallas_src>

<mosaic_0001>
module attributes {stable_mosaic.version = 11 : i64} {
  func.func @spatial_attn_kernel(%arg0: i32, %arg1: memref<1x4x16x16xf32, #tpu.memory_space<vmem>>, %arg2: memref<196xf32, #tpu.memory_space<smem>>, %arg3: memref<1xf32, #tpu.memory_space<smem>>, %arg4: memref<1x4x16x16xf32, #tpu.memory_space<vmem>>, %arg5: memref<24x128xf32, #tpu.memory_space<vmem>>) attributes {dimension_semantics = [#tpu.dimension_semantics<parallel>], iteration_bounds = array<i64: 2>, scalar_prefetch = 0 : i64, scratch_operands = 1 : i64, tpu.core_type = #tpu.core_type<tc>, window_params = [{transform_indices = @transform_0, window_bounds = array<i64: 1, 4, 16, 16>}, {transform_indices = @transform_1, window_bounds = array<i64: 196>}, {transform_indices = @transform_2, window_bounds = array<i64: 1>}, {transform_indices = @transform_3, window_bounds = array<i64: 1, 4, 16, 16>}]} {
    %cst = arith.constant 0.000000e+00 : f32
    %0 = vector.broadcast %cst : f32 to vector<8x128xf32>
    %c16 = arith.constant 16 : index
    %c0 = arith.constant 0 : index
    %1 = vector.load %arg5[%c16, %c0] : memref<24x128xf32, #tpu.memory_space<vmem>>, vector<8x128xf32>
    tpu.vector_store %arg5[%c16, %c0], %0 {strides = array<i32>} : memref<24x128xf32, #tpu.memory_space<vmem>>, vector<8x128xf32>,
    %cst_0 = arith.constant 0.000000e+00 : f32
    %2 = vector.broadcast %cst_0 : f32 to vector<16x112xf32>
    %c0_1 = arith.constant 0 : index
    %c16_2 = arith.constant 16 : index
    %3 = vector.load %arg5[%c0_1, %c16_2] : memref<24x128xf32, #tpu.memory_space<vmem>>, vector<16x112xf32>
    tpu.vector_store %arg5[%c0_1, %c16_2], %2 {strides = array<i32>} : memref<24x128xf32, #tpu.memory_space<vmem>>, vector<16x112xf32>,
    %cst_3 = arith.constant 0.000000e+00 : f32
    %4 = vector.broadcast %cst_3 : f32 to vector<24x128xf32>
    %c0_4 = arith.constant 0 : index
    %5 = memref.load %arg3[%c0_4] : memref<1xf32, #tpu.memory_space<smem>>
    %6 = vector.broadcast %5 : f32 to vector<24x128xf32>
    %7 = arith.addf %4, %6 : vector<24x128xf32>
    %c0_i32 = arith.constant 0 : i32
    %c4_i32 = arith.constant 4 : i32
    %8 = arith.addi %c0_i32, %c4_i32 : i32
    %c1_i32 = arith.constant 1 : i32
    %9 = scf.for %arg6 = %c0_i32 to %8 step %c1_i32 iter_args(%arg7 = %7) -> (vector<24x128xf32>)  : i32 {
      %c0_15 = arith.constant 0 : index
      %24 = arith.index_cast %arg6 : i32 to index
      %c0_16 = arith.constant 0 : index
      %c0_17 = arith.constant 0 : index
      %25 = vector.load %arg1[%c0_15, %24, %c0_16, %c0_17] : memref<1x4x16x16xf32, #tpu.memory_space<vmem>>, vector<1x1x16x16xf32>
      %26 = vector.shape_cast %25 : vector<1x1x16x16xf32> to vector<16x16xf32>
      %c0_18 = arith.constant 0 : index
      %c0_19 = arith.constant 0 : index
      %27 = vector.load %arg5[%c0_18, %c0_19] : memref<24x128xf32, #tpu.memory_space<vmem>>, vector<16x16xf32>
      tpu.vector_store %arg5[%c0_18, %c0_19], %26 {strides = array<i32>} : memref<24x128xf32, #tpu.memory_space<vmem>>, vector<16x16xf32>,
      %c0_20 = arith.constant 0 : index
      %c0_21 = arith.constant 0 : index
      %28 = vector.load %arg5[%c0_20, %c0_21] : memref<24x128xf32, #tpu.memory_space<vmem>>, vector<24x128xf32>
      %c3_i32 = arith.constant 3 : i32
      %29 = tpu.dynamic_rotate %28 by %c3_i32 dim 0 : vector<24x128xf32>, i32 -> vector<24x128xf32>
      %c3_i32_22 = arith.constant 3 : i32
      %30 = tpu.dynamic_rotate %29 by %c3_i32_22 dim 1 : vector<24x128xf32>, i32 -> vector<24x128xf32>
      %c49_i32 = arith.constant 49 : i32
      %31 = arith.muli %arg6, %c49_i32 : i32
      %c0_i32_23 = arith.constant 0 : i32
      %32 = arith.addi %31, %c0_i32_23 : i32
      %c0_i32_24 = arith.constant 0 : i32
      %33 = arith.addi %32, %c0_i32_24 : i32
      %34 = arith.index_cast %33 : i32 to index
      %35 = memref.load %arg2[%34] : memref<196xf32, #tpu.memory_space<smem>>
      %36 = vector.broadcast %35 : f32 to vector<24x128xf32>
      %37 = arith.mulf %30, %36 : vector<24x128xf32>
      %38 = arith.addf %arg7, %37 : vector<24x128xf32>
      %c2_i32 = arith.constant 2 : i32
      %39 = tpu.dynamic_rotate %29 by %c2_i32 dim 1 : vector<24x128xf32>, i32 -> vector<24x128xf32>
      %c49_i32_25 = arith.constant 49 : i32
      %40 = arith.muli %arg6, %c49_i32_25 : i32
      %c0_i32_26 = arith.constant 0 : i32
      %41 = arith.addi %40, %c0_i32_26 : i32
      %c1_i32_27 = arith.constant 1 : i32
      %42 = arith.addi %41, %c1_i32_27 : i32
      %43 = arith.index_cast %42 : i32 to index
      %44 = memref.load %arg2[%43] : memref<196xf32, #tpu.memory_space<smem>>
      %45 = vector.broadcast %44 : f32 to vector<24x128xf32>
      %46 = arith.mulf %39, %45 : vector<24x128xf32>
      %47 = arith.addf %38, %46 : vector<24x128xf32>
      %c1_i32_28 = arith.constant 1 : i32
      %48 = tpu.dynamic_rotate %29 by %c1_i32_28 dim 1 : vector<24x128xf32>, i32 -> vector<24x128xf32>
      %c49_i32_29 = arith.constant 49 : i32
      %49 = arith.muli %arg6, %c49_i32_29 : i32
      %c0_i32_30 = arith.constant 0 : i32
      %50 = arith.addi %49, %c0_i32_30 : i32
      %c2_i32_31 = arith.constant 2 : i32
      %51 = arith.addi %50, %c2_i32_31 : i32
      %52 = arith.index_cast %51 : i32 to index
      %53 = memref.load %arg2[%52] : memref<196xf32, #tpu.memory_space<smem>>
      %54 = vector.broadcast %53 : f32 to vector<24x128xf32>
      %55 = arith.mulf %48, %54 : vector<24x128xf32>
      %56 = arith.addf %47, %55 : vector<24x128xf32>
      %c49_i32_32 = arith.constant 49 : i32
      %57 = arith.muli %arg6, %c49_i32_32 : i32
      %c0_i32_33 = arith.constant 0 : i32
      %58 = arith.addi %57, %c0_i32_33 : i32
      %c3_i32_34 = arith.constant 3 : i32
      %59 = arith.addi %58, %c3_i32_34 : i32
      %60 = arith.index_cast %59 : i32 to index
      %61 = memref.load %arg2[%60] : memref<196xf32, #tpu.memory_space<smem>>
      %62 = vector.broadcast %61 : f32 to vector<24x128xf32>
      %63 = arith.mulf %29, %62 : vector<24x128xf32>
      %64 = arith.addf %56, %63 : vector<24x128xf32>
      %c127_i32 = arith.constant 127 : i32
      %65 = tpu.dynamic_rotate %29 by %c127_i32 dim 1 : vector<24x128xf32>, i32 -> vector<24x128xf32>
      %c49_i32_35 = arith.constant 49 : i32
      %66 = arith.muli %arg6, %c49_i32_35 : i32
      %c0_i32_36 = arith.constant 0 : i32
      %67 = arith.addi %66, %c0_i32_36 : i32
      %c4_i32_37 = arith.constant 4 : i32
      %68 = arith.addi %67, %c4_i32_37 : i32
      %69 = arith.index_cast %68 : i32 to index
      %70 = memref.load %arg2[%69] : memref<196xf32, #tpu.memory_space<smem>>
      %71 = vector.broadcast %70 : f32 to vector<24x128xf32>
      %72 = arith.mulf %65, %71 : vector<24x128xf32>
      %73 = arith.addf %64, %72 : vector<24x128xf32>
      %c126_i32 = arith.constant 126 : i32
      %74 = tpu.dynamic_rotate %29 by %c126_i32 dim 1 : vector<24x128xf32>, i32 -> vector<24x128xf32>
      %c49_i32_38 = arith.constant 49 : i32
      %75 = arith.muli %arg6, %c49_i32_38 : i32
      %c0_i32_39 = arith.constant 0 : i32
      %76 = arith.addi %75, %c0_i32_39 : i32
      %c5_i32 = arith.constant 5 : i32
      %77 = arith.addi %76, %c5_i32 : i32
      %78 = arith.index_cast %77 : i32 to index
      %79 = memref.load %arg2[%78] : memref<196xf32, #tpu.memory_space<smem>>
      %80 = vector.broadcast %79 : f32 to vector<24x128xf32>
      %81 = arith.mulf %74, %80 : vector<24x128xf32>
      %82 = arith.addf %73, %81 : vector<24x128xf32>
      %c125_i32 = arith.constant 125 : i32
      %83 = tpu.dynamic_rotate %29 by %c125_i32 dim 1 : vector<24x128xf32>, i32 -> vector<24x128xf32>
      %c49_i32_40 = arith.constant 49 : i32
      %84 = arith.muli %arg6, %c49_i32_40 : i32
      %c0_i32_41 = arith.constant 0 : i32
      %85 = arith.addi %84, %c0_i32_41 : i32
      %c6_i32 = arith.constant 6 : i32
      %86 = arith.addi %85, %c6_i32 : i32
      %87 = arith.index_cast %86 : i32 to index
      %88 = memref.load %arg2[%87] : memref<196xf32, #tpu.memory_space<smem>>
      %89 = vector.broadcast %88 : f32 to vector<24x128xf32>
      %90 = arith.mulf %83, %89 : vector<24x128xf32>
      %91 = arith.addf %82, %90 : vector<24x128xf32>
      %c2_i32_42 = arith.constant 2 : i32
      %92 = tpu.dynamic_rotate %28 by %c2_i32_42 dim 0 : vector<24x128xf32>, i32 -> vector<24x128xf32>
      %c3_i32_43 = arith.constant 3 : i32
      %93 = tpu.dynamic_rotate %92 by %c3_i32_43 dim 1 : vector<24x128xf32>, i32 -> vector<24x128xf32>
      %c49_i32_44 = arith.constant 49 : i32
      %94 = arith.muli %arg6, %c49_i32_44 : i32
      %c7_i32 = arith.constant 7 : i32
      %95 = arith.addi %94, %c7_i32 : i32
      %c0_i32_45 = arith.constant 0 : i32
      %96 = arith.addi %95, %c0_i32_45 : i32
      %97 = arith.index_cast %96 : i32 to index
      %98 = memref.load %arg2[%97] : memref<196xf32, #tpu.memory_space<smem>>
      %99 = vector.broadcast %98 : f32 to vector<24x128xf32>
      %100 = arith.mulf %93, %99 : vector<24x128xf32>
      %101 = arith.addf %91, %100 : vector<24x128xf32>
      %c2_i32_46 = arith.constant 2 : i32
      %102 = tpu.dynamic_rotate %92 by %c2_i32_46 dim 1 : vector<24x128xf32>, i32 -> vector<24x128xf32>
      %c49_i32_47 = arith.constant 49 : i32
      %103 = arith.muli %arg6, %c49_i32_47 : i32
      %c7_i32_48 = arith.constant 7 : i32
      %104 = arith.addi %103, %c7_i32_48 : i32
      %c1_i32_49 = arith.constant 1 : i32
      %105 = arith.addi %104, %c1_i32_49 : i32
      %106 = arith.index_cast %105 : i32 to index
      %107 = memref.load %arg2[%106] : memref<196xf32, #tpu.memory_space<smem>>
      %108 = vector.broadcast %107 : f32 to vector<24x128xf32>
      %109 = arith.mulf %102, %108 : vector<24x128xf32>
      %110 = arith.addf %101, %109 : vector<24x128xf32>
      %c1_i32_50 = arith.constant 1 : i32
      %111 = tpu.dynamic_rotate %92 by %c1_i32_50 dim 1 : vector<24x128xf32>, i32 -> vector<24x128xf32>
      %c49_i32_51 = arith.constant 49 : i32
      %112 = arith.muli %arg6, %c49_i32_51 : i32
      %c7_i32_52 = arith.constant 7 : i32
      %113 = arith.addi %112, %c7_i32_52 : i32
      %c2_i32_53 = arith.constant 2 : i32
      %114 = arith.addi %113, %c2_i32_53 : i32
      %115 = arith.index_cast %114 : i32 to index
      %116 = memref.load %arg2[%115] : memref<196xf32, #tpu.memory_space<smem>>
      %117 = vector.broadcast %116 : f32 to vector<24x128xf32>
      %118 = arith.mulf %111, %117 : vector<24x128xf32>
      %119 = arith.addf %110, %118 : vector<24x128xf32>
      %c49_i32_54 = arith.constant 49 : i32
      %120 = arith.muli %arg6, %c49_i32_54 : i32
      %c7_i32_55 = arith.constant 7 : i32
      %121 = arith.addi %120, %c7_i32_55 : i32
      %c3_i32_56 = arith.constant 3 : i32
      %122 = arith.addi %121, %c3_i32_56 : i32
      %123 = arith.index_cast %122 : i32 to index
      %124 = memref.load %arg2[%123] : memref<196xf32, #tpu.memory_space<smem>>
      %125 = vector.broadcast %124 : f32 to vector<24x128xf32>
      %126 = arith.mulf %92, %125 : vector<24x128xf32>
      %127 = arith.addf %119, %126 : vector<24x128xf32>
      %c127_i32_57 = arith.constant 127 : i32
      %128 = tpu.dynamic_rotate %92 by %c127_i32_57 dim 1 : vector<24x128xf32>, i32 -> vector<24x128xf32>
      %c49_i32_58 = arith.constant 49 : i32
      %129 = arith.muli %arg6, %c49_i32_58 : i32
      %c7_i32_59 = arith.constant 7 : i32
      %130 = arith.addi %129, %c7_i32_59 : i32
      %c4_i32_60 = arith.constant 4 : i32
      %131 = arith.addi %130, %c4_i32_60 : i32
      %132 = arith.index_cast %131 : i32 to index
      %133 = memref.load %arg2[%132] : memref<196xf32, #tpu.memory_space<smem>>
      %134 = vector.broadcast %133 : f32 to vector<24x128xf32>
      %135 = arith.mulf %128, %134 : vector<24x128xf32>
      %136 = arith.addf %127, %135 : vector<24x128xf32>
      %c126_i32_61 = arith.constant 126 : i32
      %137 = tpu.dynamic_rotate %92 by %c126_i32_61 dim 1 : vector<24x128xf32>, i32 -> vector<24x128xf32>
      %c49_i32_62 = arith.constant 49 : i32
      %138 = arith.muli %arg6, %c49_i32_62 : i32
      %c7_i32_63 = arith.constant 7 : i32
      %139 = arith.addi %138, %c7_i32_63 : i32
      %c5_i32_64 = arith.constant 5 : i32
      %140 = arith.addi %139, %c5_i32_64 : i32
      %141 = arith.index_cast %140 : i32 to index
      %142 = memref.load %arg2[%141] : memref<196xf32, #tpu.memory_space<smem>>
      %143 = vector.broadcast %142 : f32 to vector<24x128xf32>
      %144 = arith.mulf %137, %143 : vector<24x128xf32>
      %145 = arith.addf %136, %144 : vector<24x128xf32>
      %c125_i32_65 = arith.constant 125 : i32
      %146 = tpu.dynamic_rotate %92 by %c125_i32_65 dim 1 : vector<24x128xf32>, i32 -> vector<24x128xf32>
      %c49_i32_66 = arith.constant 49 : i32
      %147 = arith.muli %arg6, %c49_i32_66 : i32
      %c7_i32_67 = arith.constant 7 : i32
      %148 = arith.addi %147, %c7_i32_67 : i32
      %c6_i32_68 = arith.constant 6 : i32
      %149 = arith.addi %148, %c6_i32_68 : i32
      %150 = arith.index_cast %149 : i32 to index
      %151 = memref.load %arg2[%150] : memref<196xf32, #tpu.memory_space<smem>>
      %152 = vector.broadcast %151 : f32 to vector<24x128xf32>
      %153 = arith.mulf %146, %152 : vector<24x128xf32>
      %154 = arith.addf %145, %153 : vector<24x128xf32>
      %c1_i32_69 = arith.constant 1 : i32
      %155 = tpu.dynamic_rotate %28 by %c1_i32_69 dim 0 : vector<24x128xf32>, i32 -> vector<24x128xf32>
      %c3_i32_70 = arith.constant 3 : i32
      %156 = tpu.dynamic_rotate %155 by %c3_i32_70 dim 1 : vector<24x128xf32>, i32 -> vector<24x128xf32>
      %c49_i32_71 = arith.constant 49 : i32
      %157 = arith.muli %arg6, %c49_i32_71 : i32
      %c14_i32 = arith.constant 14 : i32
      %158 = arith.addi %157, %c14_i32 : i32
      %c0_i32_72 = arith.constant 0 : i32
      %159 = arith.addi %158, %c0_i32_72 : i32
      %160 = arith.index_cast %159 : i32 to index
      %161 = memref.load %arg2[%160] : memref<196xf32, #tpu.memory_space<smem>>
      %162 = vector.broadcast %161 : f32 to vector<24x128xf32>
      %163 = arith.mulf %156, %162 : vector<24x128xf32>
      %164 = arith.addf %154, %163 : vector<24x128xf32>
      %c2_i32_73 = arith.constant 2 : i32
      %165 = tpu.dynamic_rotate %155 by %c2_i32_73 dim 1 : vector<24x128xf32>, i32 -> vector<24x128xf32>
      %c49_i32_74 = arith.constant 49 : i32
      %166 = arith.muli %arg6, %c49_i32_74 : i32
      %c14_i32_75 = arith.constant 14 : i32
      %167 = arith.addi %166, %c14_i32_75 : i32
      %c1_i32_76 = arith.constant 1 : i32
      %168 = arith.addi %167, %c1_i32_76 : i32
      %169 = arith.index_cast %168 : i32 to index
      %170 = memref.load %arg2[%169] : memref<196xf32, #tpu.memory_space<smem>>
      %171 = vector.broadcast %170 : f32 to vector<24x128xf32>
      %172 = arith.mulf %165, %171 : vector<24x128xf32>
      %173 = arith.addf %164, %172 : vector<24x128xf32>
      %c1_i32_77 = arith.constant 1 : i32
      %174 = tpu.dynamic_rotate %155 by %c1_i32_77 dim 1 : vector<24x128xf32>, i32 -> vector<24x128xf32>
      %c49_i32_78 = arith.constant 49 : i32
      %175 = arith.muli %arg6, %c49_i32_78 : i32
      %c14_i32_79 = arith.constant 14 : i32
      %176 = arith.addi %175, %c14_i32_79 : i32
      %c2_i32_80 = arith.constant 2 : i32
      %177 = arith.addi %176, %c2_i32_80 : i32
      %178 = arith.index_cast %177 : i32 to index
      %179 = memref.load %arg2[%178] : memref<196xf32, #tpu.memory_space<smem>>
      %180 = vector.broadcast %179 : f32 to vector<24x128xf32>
      %181 = arith.mulf %174, %180 : vector<24x128xf32>
      %182 = arith.addf %173, %181 : vector<24x128xf32>
      %c49_i32_81 = arith.constant 49 : i32
      %183 = arith.muli %arg6, %c49_i32_81 : i32
      %c14_i32_82 = arith.constant 14 : i32
      %184 = arith.addi %183, %c14_i32_82 : i32
      %c3_i32_83 = arith.constant 3 : i32
      %185 = arith.addi %184, %c3_i32_83 : i32
      %186 = arith.index_cast %185 : i32 to index
      %187 = memref.load %arg2[%186] : memref<196xf32, #tpu.memory_space<smem>>
      %188 = vector.broadcast %187 : f32 to vector<24x128xf32>
      %189 = arith.mulf %155, %188 : vector<24x128xf32>
      %190 = arith.addf %182, %189 : vector<24x128xf32>
      %c127_i32_84 = arith.constant 127 : i32
      %191 = tpu.dynamic_rotate %155 by %c127_i32_84 dim 1 : vector<24x128xf32>, i32 -> vector<24x128xf32>
      %c49_i32_85 = arith.constant 49 : i32
      %192 = arith.muli %arg6, %c49_i32_85 : i32
      %c14_i32_86 = arith.constant 14 : i32
      %193 = arith.addi %192, %c14_i32_86 : i32
      %c4_i32_87 = arith.constant 4 : i32
      %194 = arith.addi %193, %c4_i32_87 : i32
      %195 = arith.index_cast %194 : i32 to index
      %196 = memref.load %arg2[%195] : memref<196xf32, #tpu.memory_space<smem>>
      %197 = vector.broadcast %196 : f32 to vector<24x128xf32>
      %198 = arith.mulf %191, %197 : vector<24x128xf32>
      %199 = arith.addf %190, %198 : vector<24x128xf32>
      %c126_i32_88 = arith.constant 126 : i32
      %200 = tpu.dynamic_rotate %155 by %c126_i32_88 dim 1 : vector<24x128xf32>, i32 -> vector<24x128xf32>
      %c49_i32_89 = arith.constant 49 : i32
      %201 = arith.muli %arg6, %c49_i32_89 : i32
      %c14_i32_90 = arith.constant 14 : i32
      %202 = arith.addi %201, %c14_i32_90 : i32
      %c5_i32_91 = arith.constant 5 : i32
      %203 = arith.addi %202, %c5_i32_91 : i32
      %204 = arith.index_cast %203 : i32 to index
      %205 = memref.load %arg2[%204] : memref<196xf32, #tpu.memory_space<smem>>
      %206 = vector.broadcast %205 : f32 to vector<24x128xf32>
      %207 = arith.mulf %200, %206 : vector<24x128xf32>
      %208 = arith.addf %199, %207 : vector<24x128xf32>
      %c125_i32_92 = arith.constant 125 : i32
      %209 = tpu.dynamic_rotate %155 by %c125_i32_92 dim 1 : vector<24x128xf32>, i32 -> vector<24x128xf32>
      %c49_i32_93 = arith.constant 49 : i32
      %210 = arith.muli %arg6, %c49_i32_93 : i32
      %c14_i32_94 = arith.constant 14 : i32
      %211 = arith.addi %210, %c14_i32_94 : i32
      %c6_i32_95 = arith.constant 6 : i32
      %212 = arith.addi %211, %c6_i32_95 : i32
      %213 = arith.index_cast %212 : i32 to index
      %214 = memref.load %arg2[%213] : memref<196xf32, #tpu.memory_space<smem>>
      %215 = vector.broadcast %214 : f32 to vector<24x128xf32>
      %216 = arith.mulf %209, %215 : vector<24x128xf32>
      %217 = arith.addf %208, %216 : vector<24x128xf32>
      %c3_i32_96 = arith.constant 3 : i32
      %218 = tpu.dynamic_rotate %28 by %c3_i32_96 dim 1 : vector<24x128xf32>, i32 -> vector<24x128xf32>
      %c49_i32_97 = arith.constant 49 : i32
      %219 = arith.muli %arg6, %c49_i32_97 : i32
      %c21_i32 = arith.constant 21 : i32
      %220 = arith.addi %219, %c21_i32 : i32
      %c0_i32_98 = arith.constant 0 : i32
      %221 = arith.addi %220, %c0_i32_98 : i32
      %222 = arith.index_cast %221 : i32 to index
      %223 = memref.load %arg2[%222] : memref<196xf32, #tpu.memory_space<smem>>
      %224 = vector.broadcast %223 : f32 to vector<24x128xf32>
      %225 = arith.mulf %218, %224 : vector<24x128xf32>
      %226 = arith.addf %217, %225 : vector<24x128xf32>
      %c2_i32_99 = arith.constant 2 : i32
      %227 = tpu.dynamic_rotate %28 by %c2_i32_99 dim 1 : vector<24x128xf32>, i32 -> vector<24x128xf32>
      %c49_i32_100 = arith.constant 49 : i32
      %228 = arith.muli %arg6, %c49_i32_100 : i32
      %c21_i32_101 = arith.constant 21 : i32
      %229 = arith.addi %228, %c21_i32_101 : i32
      %c1_i32_102 = arith.constant 1 : i32
      %230 = arith.addi %229, %c1_i32_102 : i32
      %231 = arith.index_cast %230 : i32 to index
      %232 = memref.load %arg2[%231] : memref<196xf32, #tpu.memory_space<smem>>
      %233 = vector.broadcast %232 : f32 to vector<24x128xf32>
      %234 = arith.mulf %227, %233 : vector<24x128xf32>
      %235 = arith.addf %226, %234 : vector<24x128xf32>
      %c1_i32_103 = arith.constant 1 : i32
      %236 = tpu.dynamic_rotate %28 by %c1_i32_103 dim 1 : vector<24x128xf32>, i32 -> vector<24x128xf32>
      %c49_i32_104 = arith.constant 49 : i32
      %237 = arith.muli %arg6, %c49_i32_104 : i32
      %c21_i32_105 = arith.constant 21 : i32
      %238 = arith.addi %237, %c21_i32_105 : i32
      %c2_i32_106 = arith.constant 2 : i32
      %239 = arith.addi %238, %c2_i32_106 : i32
      %240 = arith.index_cast %239 : i32 to index
      %241 = memref.load %arg2[%240] : memref<196xf32, #tpu.memory_space<smem>>
      %242 = vector.broadcast %241 : f32 to vector<24x128xf32>
      %243 = arith.mulf %236, %242 : vector<24x128xf32>
      %244 = arith.addf %235, %243 : vector<24x128xf32>
      %c49_i32_107 = arith.constant 49 : i32
      %245 = arith.muli %arg6, %c49_i32_107 : i32
      %c21_i32_108 = arith.constant 21 : i32
      %246 = arith.addi %245, %c21_i32_108 : i32
      %c3_i32_109 = arith.constant 3 : i32
      %247 = arith.addi %246, %c3_i32_109 : i32
      %248 = arith.index_cast %247 : i32 to index
      %249 = memref.load %arg2[%248] : memref<196xf32, #tpu.memory_space<smem>>
      %250 = vector.broadcast %249 : f32 to vector<24x128xf32>
      %251 = arith.mulf %28, %250 : vector<24x128xf32>
      %252 = arith.addf %244, %251 : vector<24x128xf32>
      %c127_i32_110 = arith.constant 127 : i32
      %253 = tpu.dynamic_rotate %28 by %c127_i32_110 dim 1 : vector<24x128xf32>, i32 -> vector<24x128xf32>
      %c49_i32_111 = arith.constant 49 : i32
      %254 = arith.muli %arg6, %c49_i32_111 : i32
      %c21_i32_112 = arith.constant 21 : i32
      %255 = arith.addi %254, %c21_i32_112 : i32
      %c4_i32_113 = arith.constant 4 : i32
      %256 = arith.addi %255, %c4_i32_113 : i32
      %257 = arith.index_cast %256 : i32 to index
      %258 = memref.load %arg2[%257] : memref<196xf32, #tpu.memory_space<smem>>
      %259 = vector.broadcast %258 : f32 to vector<24x128xf32>
      %260 = arith.mulf %253, %259 : vector<24x128xf32>
      %261 = arith.addf %252, %260 : vector<24x128xf32>
      %c126_i32_114 = arith.constant 126 : i32
      %262 = tpu.dynamic_rotate %28 by %c126_i32_114 dim 1 : vector<24x128xf32>, i32 -> vector<24x128xf32>
      %c49_i32_115 = arith.constant 49 : i32
      %263 = arith.muli %arg6, %c49_i32_115 : i32
      %c21_i32_116 = arith.constant 21 : i32
      %264 = arith.addi %263, %c21_i32_116 : i32
      %c5_i32_117 = arith.constant 5 : i32
      %265 = arith.addi %264, %c5_i32_117 : i32
      %266 = arith.index_cast %265 : i32 to index
      %267 = memref.load %arg2[%266] : memref<196xf32, #tpu.memory_space<smem>>
      %268 = vector.broadcast %267 : f32 to vector<24x128xf32>
      %269 = arith.mulf %262, %268 : vector<24x128xf32>
      %270 = arith.addf %261, %269 : vector<24x128xf32>
      %c125_i32_118 = arith.constant 125 : i32
      %271 = tpu.dynamic_rotate %28 by %c125_i32_118 dim 1 : vector<24x128xf32>, i32 -> vector<24x128xf32>
      %c49_i32_119 = arith.constant 49 : i32
      %272 = arith.muli %arg6, %c49_i32_119 : i32
      %c21_i32_120 = arith.constant 21 : i32
      %273 = arith.addi %272, %c21_i32_120 : i32
      %c6_i32_121 = arith.constant 6 : i32
      %274 = arith.addi %273, %c6_i32_121 : i32
      %275 = arith.index_cast %274 : i32 to index
      %276 = memref.load %arg2[%275] : memref<196xf32, #tpu.memory_space<smem>>
      %277 = vector.broadcast %276 : f32 to vector<24x128xf32>
      %278 = arith.mulf %271, %277 : vector<24x128xf32>
      %279 = arith.addf %270, %278 : vector<24x128xf32>
      %c23_i32 = arith.constant 23 : i32
      %280 = tpu.dynamic_rotate %28 by %c23_i32 dim 0 : vector<24x128xf32>, i32 -> vector<24x128xf32>
      %c3_i32_122 = arith.constant 3 : i32
      %281 = tpu.dynamic_rotate %280 by %c3_i32_122 dim 1 : vector<24x128xf32>, i32 -> vector<24x128xf32>
      %c49_i32_123 = arith.constant 49 : i32
      %282 = arith.muli %arg6, %c49_i32_123 : i32
      %c28_i32 = arith.constant 28 : i32
      %283 = arith.addi %282, %c28_i32 : i32
      %c0_i32_124 = arith.constant 0 : i32
      %284 = arith.addi %283, %c0_i32_124 : i32
      %285 = arith.index_cast %284 : i32 to index
      %286 = memref.load %arg2[%285] : memref<196xf32, #tpu.memory_space<smem>>
      %287 = vector.broadcast %286 : f32 to vector<24x128xf32>
      %288 = arith.mulf %281, %287 : vector<24x128xf32>
      %289 = arith.addf %279, %288 : vector<24x128xf32>
      %c2_i32_125 = arith.constant 2 : i32
      %290 = tpu.dynamic_rotate %280 by %c2_i32_125 dim 1 : vector<24x128xf32>, i32 -> vector<24x128xf32>
      %c49_i32_126 = arith.constant 49 : i32
      %291 = arith.muli %arg6, %c49_i32_126 : i32
      %c28_i32_127 = arith.constant 28 : i32
      %292 = arith.addi %291, %c28_i32_127 : i32
      %c1_i32_128 = arith.constant 1 : i32
      %293 = arith.addi %292, %c1_i32_128 : i32
      %294 = arith.index_cast %293 : i32 to index
      %295 = memref.load %arg2[%294] : memref<196xf32, #tpu.memory_space<smem>>
      %296 = vector.broadcast %295 : f32 to vector<24x128xf32>
      %297 = arith.mulf %290, %296 : vector<24x128xf32>
      %298 = arith.addf %289, %297 : vector<24x128xf32>
      %c1_i32_129 = arith.constant 1 : i32
      %299 = tpu.dynamic_rotate %280 by %c1_i32_129 dim 1 : vector<24x128xf32>, i32 -> vector<24x128xf32>
      %c49_i32_130 = arith.constant 49 : i32
      %300 = arith.muli %arg6, %c49_i32_130 : i32
      %c28_i32_131 = arith.constant 28 : i32
      %301 = arith.addi %300, %c28_i32_131 : i32
      %c2_i32_132 = arith.constant 2 : i32
      %302 = arith.addi %301, %c2_i32_132 : i32
      %303 = arith.index_cast %302 : i32 to index
      %304 = memref.load %arg2[%303] : memref<196xf32, #tpu.memory_space<smem>>
      %305 = vector.broadcast %304 : f32 to vector<24x128xf32>
      %306 = arith.mulf %299, %305 : vector<24x128xf32>
      %307 = arith.addf %298, %306 : vector<24x128xf32>
      %c49_i32_133 = arith.constant 49 : i32
      %308 = arith.muli %arg6, %c49_i32_133 : i32
      %c28_i32_134 = arith.constant 28 : i32
      %309 = arith.addi %308, %c28_i32_134 : i32
      %c3_i32_135 = arith.constant 3 : i32
      %310 = arith.addi %309, %c3_i32_135 : i32
      %311 = arith.index_cast %310 : i32 to index
      %312 = memref.load %arg2[%311] : memref<196xf32, #tpu.memory_space<smem>>
      %313 = vector.broadcast %312 : f32 to vector<24x128xf32>
      %314 = arith.mulf %280, %313 : vector<24x128xf32>
      %315 = arith.addf %307, %314 : vector<24x128xf32>
      %c127_i32_136 = arith.constant 127 : i32
      %316 = tpu.dynamic_rotate %280 by %c127_i32_136 dim 1 : vector<24x128xf32>, i32 -> vector<24x128xf32>
      %c49_i32_137 = arith.constant 49 : i32
      %317 = arith.muli %arg6, %c49_i32_137 : i32
      %c28_i32_138 = arith.constant 28 : i32
      %318 = arith.addi %317, %c28_i32_138 : i32
      %c4_i32_139 = arith.constant 4 : i32
      %319 = arith.addi %318, %c4_i32_139 : i32
      %320 = arith.index_cast %319 : i32 to index
      %321 = memref.load %arg2[%320] : memref<196xf32, #tpu.memory_space<smem>>
      %322 = vector.broadcast %321 : f32 to vector<24x128xf32>
      %323 = arith.mulf %316, %322 : vector<24x128xf32>
      %324 = arith.addf %315, %323 : vector<24x128xf32>
      %c126_i32_140 = arith.constant 126 : i32
      %325 = tpu.dynamic_rotate %280 by %c126_i32_140 dim 1 : vector<24x128xf32>, i32 -> vector<24x128xf32>
      %c49_i32_141 = arith.constant 49 : i32
      %326 = arith.muli %arg6, %c49_i32_141 : i32
      %c28_i32_142 = arith.constant 28 : i32
      %327 = arith.addi %326, %c28_i32_142 : i32
      %c5_i32_143 = arith.constant 5 : i32
      %328 = arith.addi %327, %c5_i32_143 : i32
      %329 = arith.index_cast %328 : i32 to index
      %330 = memref.load %arg2[%329] : memref<196xf32, #tpu.memory_space<smem>>
      %331 = vector.broadcast %330 : f32 to vector<24x128xf32>
      %332 = arith.mulf %325, %331 : vector<24x128xf32>
      %333 = arith.addf %324, %332 : vector<24x128xf32>
      %c125_i32_144 = arith.constant 125 : i32
      %334 = tpu.dynamic_rotate %280 by %c125_i32_144 dim 1 : vector<24x128xf32>, i32 -> vector<24x128xf32>
      %c49_i32_145 = arith.constant 49 : i32
      %335 = arith.muli %arg6, %c49_i32_145 : i32
      %c28_i32_146 = arith.constant 28 : i32
      %336 = arith.addi %335, %c28_i32_146 : i32
      %c6_i32_147 = arith.constant 6 : i32
      %337 = arith.addi %336, %c6_i32_147 : i32
      %338 = arith.index_cast %337 : i32 to index
      %339 = memref.load %arg2[%338] : memref<196xf32, #tpu.memory_space<smem>>
      %340 = vector.broadcast %339 : f32 to vector<24x128xf32>
      %341 = arith.mulf %334, %340 : vector<24x128xf32>
      %342 = arith.addf %333, %341 : vector<24x128xf32>
      %c22_i32 = arith.constant 22 : i32
      %343 = tpu.dynamic_rotate %28 by %c22_i32 dim 0 : vector<24x128xf32>, i32 -> vector<24x128xf32>
      %c3_i32_148 = arith.constant 3 : i32
      %344 = tpu.dynamic_rotate %343 by %c3_i32_148 dim 1 : vector<24x128xf32>, i32 -> vector<24x128xf32>
      %c49_i32_149 = arith.constant 49 : i32
      %345 = arith.muli %arg6, %c49_i32_149 : i32
      %c35_i32 = arith.constant 35 : i32
      %346 = arith.addi %345, %c35_i32 : i32
      %c0_i32_150 = arith.constant 0 : i32
      %347 = arith.addi %346, %c0_i32_150 : i32
      %348 = arith.index_cast %347 : i32 to index
      %349 = memref.load %arg2[%348] : memref<196xf32, #tpu.memory_space<smem>>
      %350 = vector.broadcast %349 : f32 to vector<24x128xf32>
      %351 = arith.mulf %344, %350 : vector<24x128xf32>
      %352 = arith.addf %342, %351 : vector<24x128xf32>
      %c2_i32_151 = arith.constant 2 : i32
      %353 = tpu.dynamic_rotate %343 by %c2_i32_151 dim 1 : vector<24x128xf32>, i32 -> vector<24x128xf32>
      %c49_i32_152 = arith.constant 49 : i32
      %354 = arith.muli %arg6, %c49_i32_152 : i32
      %c35_i32_153 = arith.constant 35 : i32
      %355 = arith.addi %354, %c35_i32_153 : i32
      %c1_i32_154 = arith.constant 1 : i32
      %356 = arith.addi %355, %c1_i32_154 : i32
      %357 = arith.index_cast %356 : i32 to index
      %358 = memref.load %arg2[%357] : memref<196xf32, #tpu.memory_space<smem>>
      %359 = vector.broadcast %358 : f32 to vector<24x128xf32>
      %360 = arith.mulf %353, %359 : vector<24x128xf32>
      %361 = arith.addf %352, %360 : vector<24x128xf32>
      %c1_i32_155 = arith.constant 1 : i32
      %362 = tpu.dynamic_rotate %343 by %c1_i32_155 dim 1 : vector<24x128xf32>, i32 -> vector<24x128xf32>
      %c49_i32_156 = arith.constant 49 : i32
      %363 = arith.muli %arg6, %c49_i32_156 : i32
      %c35_i32_157 = arith.constant 35 : i32
      %364 = arith.addi %363, %c35_i32_157 : i32
      %c2_i32_158 = arith.constant 2 : i32
      %365 = arith.addi %364, %c2_i32_158 : i32
      %366 = arith.index_cast %365 : i32 to index
      %367 = memref.load %arg2[%366] : memref<196xf32, #tpu.memory_space<smem>>
      %368 = vector.broadcast %367 : f32 to vector<24x128xf32>
      %369 = arith.mulf %362, %368 : vector<24x128xf32>
      %370 = arith.addf %361, %369 : vector<24x128xf32>
      %c49_i32_159 = arith.constant 49 : i32
      %371 = arith.muli %arg6, %c49_i32_159 : i32
      %c35_i32_160 = arith.constant 35 : i32
      %372 = arith.addi %371, %c35_i32_160 : i32
      %c3_i32_161 = arith.constant 3 : i32
      %373 = arith.addi %372, %c3_i32_161 : i32
      %374 = arith.index_cast %373 : i32 to index
      %375 = memref.load %arg2[%374] : memref<196xf32, #tpu.memory_space<smem>>
      %376 = vector.broadcast %375 : f32 to vector<24x128xf32>
      %377 = arith.mulf %343, %376 : vector<24x128xf32>
      %378 = arith.addf %370, %377 : vector<24x128xf32>
      %c127_i32_162 = arith.constant 127 : i32
      %379 = tpu.dynamic_rotate %343 by %c127_i32_162 dim 1 : vector<24x128xf32>, i32 -> vector<24x128xf32>
      %c49_i32_163 = arith.constant 49 : i32
      %380 = arith.muli %arg6, %c49_i32_163 : i32
      %c35_i32_164 = arith.constant 35 : i32
      %381 = arith.addi %380, %c35_i32_164 : i32
      %c4_i32_165 = arith.constant 4 : i32
      %382 = arith.addi %381, %c4_i32_165 : i32
      %383 = arith.index_cast %382 : i32 to index
      %384 = memref.load %arg2[%383] : memref<196xf32, #tpu.memory_space<smem>>
      %385 = vector.broadcast %384 : f32 to vector<24x128xf32>
      %386 = arith.mulf %379, %385 : vector<24x128xf32>
      %387 = arith.addf %378, %386 : vector<24x128xf32>
      %c126_i32_166 = arith.constant 126 : i32
      %388 = tpu.dynamic_rotate %343 by %c126_i32_166 dim 1 : vector<24x128xf32>, i32 -> vector<24x128xf32>
      %c49_i32_167 = arith.constant 49 : i32
      %389 = arith.muli %arg6, %c49_i32_167 : i32
      %c35_i32_168 = arith.constant 35 : i32
      %390 = arith.addi %389, %c35_i32_168 : i32
      %c5_i32_169 = arith.constant 5 : i32
      %391 = arith.addi %390, %c5_i32_169 : i32
      %392 = arith.index_cast %391 : i32 to index
      %393 = memref.load %arg2[%392] : memref<196xf32, #tpu.memory_space<smem>>
      %394 = vector.broadcast %393 : f32 to vector<24x128xf32>
      %395 = arith.mulf %388, %394 : vector<24x128xf32>
      %396 = arith.addf %387, %395 : vector<24x128xf32>
      %c125_i32_170 = arith.constant 125 : i32
      %397 = tpu.dynamic_rotate %343 by %c125_i32_170 dim 1 : vector<24x128xf32>, i32 -> vector<24x128xf32>
      %c49_i32_171 = arith.constant 49 : i32
      %398 = arith.muli %arg6, %c49_i32_171 : i32
      %c35_i32_172 = arith.constant 35 : i32
      %399 = arith.addi %398, %c35_i32_172 : i32
      %c6_i32_173 = arith.constant 6 : i32
      %400 = arith.addi %399, %c6_i32_173 : i32
      %401 = arith.index_cast %400 : i32 to index
      %402 = memref.load %arg2[%401] : memref<196xf32, #tpu.memory_space<smem>>
      %403 = vector.broadcast %402 : f32 to vector<24x128xf32>
      %404 = arith.mulf %397, %403 : vector<24x128xf32>
      %405 = arith.addf %396, %404 : vector<24x128xf32>
      %c21_i32_174 = arith.constant 21 : i32
      %406 = tpu.dynamic_rotate %28 by %c21_i32_174 dim 0 : vector<24x128xf32>, i32 -> vector<24x128xf32>
      %c3_i32_175 = arith.constant 3 : i32
      %407 = tpu.dynamic_rotate %406 by %c3_i32_175 dim 1 : vector<24x128xf32>, i32 -> vector<24x128xf32>
      %c49_i32_176 = arith.constant 49 : i32
      %408 = arith.muli %arg6, %c49_i32_176 : i32
      %c42_i32 = arith.constant 42 : i32
      %409 = arith.addi %408, %c42_i32 : i32
      %c0_i32_177 = arith.constant 0 : i32
      %410 = arith.addi %409, %c0_i32_177 : i32
      %411 = arith.index_cast %410 : i32 to index
      %412 = memref.load %arg2[%411] : memref<196xf32, #tpu.memory_space<smem>>
      %413 = vector.broadcast %412 : f32 to vector<24x128xf32>
      %414 = arith.mulf %407, %413 : vector<24x128xf32>
      %415 = arith.addf %405, %414 : vector<24x128xf32>
      %c2_i32_178 = arith.constant 2 : i32
      %416 = tpu.dynamic_rotate %406 by %c2_i32_178 dim 1 : vector<24x128xf32>, i32 -> vector<24x128xf32>
      %c49_i32_179 = arith.constant 49 : i32
      %417 = arith.muli %arg6, %c49_i32_179 : i32
      %c42_i32_180 = arith.constant 42 : i32
      %418 = arith.addi %417, %c42_i32_180 : i32
      %c1_i32_181 = arith.constant 1 : i32
      %419 = arith.addi %418, %c1_i32_181 : i32
      %420 = arith.index_cast %419 : i32 to index
      %421 = memref.load %arg2[%420] : memref<196xf32, #tpu.memory_space<smem>>
      %422 = vector.broadcast %421 : f32 to vector<24x128xf32>
      %423 = arith.mulf %416, %422 : vector<24x128xf32>
      %424 = arith.addf %415, %423 : vector<24x128xf32>
      %c1_i32_182 = arith.constant 1 : i32
      %425 = tpu.dynamic_rotate %406 by %c1_i32_182 dim 1 : vector<24x128xf32>, i32 -> vector<24x128xf32>
      %c49_i32_183 = arith.constant 49 : i32
      %426 = arith.muli %arg6, %c49_i32_183 : i32
      %c42_i32_184 = arith.constant 42 : i32
      %427 = arith.addi %426, %c42_i32_184 : i32
      %c2_i32_185 = arith.constant 2 : i32
      %428 = arith.addi %427, %c2_i32_185 : i32
      %429 = arith.index_cast %428 : i32 to index
      %430 = memref.load %arg2[%429] : memref<196xf32, #tpu.memory_space<smem>>
      %431 = vector.broadcast %430 : f32 to vector<24x128xf32>
      %432 = arith.mulf %425, %431 : vector<24x128xf32>
      %433 = arith.addf %424, %432 : vector<24x128xf32>
      %c49_i32_186 = arith.constant 49 : i32
      %434 = arith.muli %arg6, %c49_i32_186 : i32
      %c42_i32_187 = arith.constant 42 : i32
      %435 = arith.addi %434, %c42_i32_187 : i32
      %c3_i32_188 = arith.constant 3 : i32
      %436 = arith.addi %435, %c3_i32_188 : i32
      %437 = arith.index_cast %436 : i32 to index
      %438 = memref.load %arg2[%437] : memref<196xf32, #tpu.memory_space<smem>>
      %439 = vector.broadcast %438 : f32 to vector<24x128xf32>
      %440 = arith.mulf %406, %439 : vector<24x128xf32>
      %441 = arith.addf %433, %440 : vector<24x128xf32>
      %c127_i32_189 = arith.constant 127 : i32
      %442 = tpu.dynamic_rotate %406 by %c127_i32_189 dim 1 : vector<24x128xf32>, i32 -> vector<24x128xf32>
      %c49_i32_190 = arith.constant 49 : i32
      %443 = arith.muli %arg6, %c49_i32_190 : i32
      %c42_i32_191 = arith.constant 42 : i32
      %444 = arith.addi %443, %c42_i32_191 : i32
      %c4_i32_192 = arith.constant 4 : i32
      %445 = arith.addi %444, %c4_i32_192 : i32
      %446 = arith.index_cast %445 : i32 to index
      %447 = memref.load %arg2[%446] : memref<196xf32, #tpu.memory_space<smem>>
      %448 = vector.broadcast %447 : f32 to vector<24x128xf32>
      %449 = arith.mulf %442, %448 : vector<24x128xf32>
      %450 = arith.addf %441, %449 : vector<24x128xf32>
      %c126_i32_193 = arith.constant 126 : i32
      %451 = tpu.dynamic_rotate %406 by %c126_i32_193 dim 1 : vector<24x128xf32>, i32 -> vector<24x128xf32>
      %c49_i32_194 = arith.constant 49 : i32
      %452 = arith.muli %arg6, %c49_i32_194 : i32
      %c42_i32_195 = arith.constant 42 : i32
      %453 = arith.addi %452, %c42_i32_195 : i32
      %c5_i32_196 = arith.constant 5 : i32
      %454 = arith.addi %453, %c5_i32_196 : i32
      %455 = arith.index_cast %454 : i32 to index
      %456 = memref.load %arg2[%455] : memref<196xf32, #tpu.memory_space<smem>>
      %457 = vector.broadcast %456 : f32 to vector<24x128xf32>
      %458 = arith.mulf %451, %457 : vector<24x128xf32>
      %459 = arith.addf %450, %458 : vector<24x128xf32>
      %c125_i32_197 = arith.constant 125 : i32
      %460 = tpu.dynamic_rotate %406 by %c125_i32_197 dim 1 : vector<24x128xf32>, i32 -> vector<24x128xf32>
      %c49_i32_198 = arith.constant 49 : i32
      %461 = arith.muli %arg6, %c49_i32_198 : i32
      %c42_i32_199 = arith.constant 42 : i32
      %462 = arith.addi %461, %c42_i32_199 : i32
      %c6_i32_200 = arith.constant 6 : i32
      %463 = arith.addi %462, %c6_i32_200 : i32
      %464 = arith.index_cast %463 : i32 to index
      %465 = memref.load %arg2[%464] : memref<196xf32, #tpu.memory_space<smem>>
      %466 = vector.broadcast %465 : f32 to vector<24x128xf32>
      %467 = arith.mulf %460, %466 : vector<24x128xf32>
      %468 = arith.addf %459, %467 : vector<24x128xf32>
      scf.yield %468 : vector<24x128xf32>
    }
    %c4_i32_5 = arith.constant 4 : i32
    %10 = vector.extract_strided_slice %9 {offsets = [0, 0], sizes = [16, 16], strides = [1, 1]} : vector<24x128xf32> to vector<16x16xf32>
    %11 = arith.negf %10 : vector<16x16xf32>
    %12 = math.exp %11 : vector<16x16xf32>
    %cst_6 = arith.constant 1.000000e+00 : f32
    %13 = vector.broadcast %cst_6 : f32 to vector<16x16xf32>
    %14 = arith.addf %13, %12 : vector<16x16xf32>
    %15 = arith.divf %13, %14 : vector<16x16xf32>
    %c0_7 = arith.constant 0 : index
    %c0_8 = arith.constant 0 : index
    %c0_9 = arith.constant 0 : index
    %c0_10 = arith.constant 0 : index
    %16 = vector.load %arg1[%c0_7, %c0_8, %c0_9, %c0_10] : memref<1x4x16x16xf32, #tpu.memory_space<vmem>>, vector<1x4x16x16xf32>
    %17 = vector.shape_cast %16 : vector<1x4x16x16xf32> to vector<4x16x16xf32>
    %18 = vector.shape_cast %15 : vector<16x16xf32> to vector<1x16x16xf32>
    %19 = vector.broadcast %18 : vector<1x16x16xf32> to vector<4x16x16xf32>
    %20 = arith.mulf %17, %19 : vector<4x16x16xf32>
    %c0_11 = arith.constant 0 : index
    %c0_12 = arith.constant 0 : index
    %c0_13 = arith.constant 0 : index
    %c0_14 = arith.constant 0 : index
    %21 = vector.load %arg4[%c0_11, %c0_12, %c0_13, %c0_14] : memref<1x4x16x16xf32, #tpu.memory_space<vmem>>, vector<1x4x16x16xf32>
    %22 = vector.shape_cast %21 : vector<1x4x16x16xf32> to vector<4x16x16xf32>
    %23 = vector.shape_cast %20 : vector<4x16x16xf32> to vector<1x4x16x16xf32>
    tpu.vector_store %arg4[%c0_11, %c0_12, %c0_13, %c0_14], %23 {strides = array<i32>} : memref<1x4x16x16xf32, #tpu.memory_space<vmem>>, vector<1x4x16x16xf32>,
    return
  }
  func.func @transform_0(%arg0: i32) -> (i32, i32, i32, i32) {
    %c0_i32 = arith.constant 0 : i32
    %c0_i32_0 = arith.constant 0 : i32
    %c0_i32_1 = arith.constant 0 : i32
    %c0_i32_2 = arith.constant 0 : i32
    return %arg0, %c0_i32, %c0_i32_0, %c0_i32_1 : i32, i32, i32, i32
  }
  func.func @transform_1(%arg0: i32) -> i32 {
    %c0_i32 = arith.constant 0 : i32
    %c0_i32_0 = arith.constant 0 : i32
    return %c0_i32 : i32
  }
  func.func @transform_2(%arg0: i32) -> i32 {
    %c0_i32 = arith.constant 0 : i32
    %c0_i32_0 = arith.constant 0 : i32
    return %c0_i32 : i32
  }
  func.func @transform_3(%arg0: i32) -> (i32, i32, i32, i32) {
    %c0_i32 = arith.constant 0 : i32
    %c0_i32_0 = arith.constant 0 : i32
    %c0_i32_1 = arith.constant 0 : i32
    %c0_i32_2 = arith.constant 0 : i32
    return %arg0, %c0_i32, %c0_i32_0, %c0_i32_1 : i32, i32, i32, i32
  }
}

</mosaic_0001>

<bundles_post_ra>
// kernel: tpu_custom_call.1
= control target key start
LH: loop header
LB: loop body
LE: loop exit
PB: predicated region body
PF: predicated region fallthrough
CT: control target
= control target key end

     0   :  { %s2094_s0 = inlined_call_operand.hbm [shape: f32[2,4,16,16], index: 0, kind: input, shape index: {}]   ;;  %s2095_s1 = inlined_call_operand.vmem [shape: f32[196], index: 1, kind: input, shape index: {}]   ;;  %s2096_s2 = inlined_call_operand.<no memory space> [shape: f32[1], index: 2, kind: input, shape index: {}]   ;;  %s2097_s3 = inlined_call_operand.hbm [shape: f32[2,4,16,16], index: 3, kind: output, shape index: {}]  }
   0x1   :  { %8 = sst [smem:[#allocation3]] %s2096_s2 }
   0x2   :  { %9 = vsyncpa [#allocation5], 0 }
   0x3   :  { %11 = vsyncpa [#allocation5 + $0x1], 0 }
   0x4   :  { %12 = vsyncpa [#allocation7], 0 }
   0x5   :  { %13 = vsyncpa [#allocation6], 0 }
   0x6   :  { %15 = vsyncpa [#allocation6 + $0x1], 0  ;;  %s1443_s14 = smov 0   ;;  %s1445_s15 = smov 0  }
   0x7   :  { %s1447_s16 = smov 0   ;;  %s1449_s17 = smov 0  }
   0x8 LB: > { %s1464_s2 = sadd.s32 4294967295, %s1394_s17   ;;  %s1146_s18 = sadd.s32 4294967294, %s1394_s17   ;;  %s1394_s17 = sphi %s1449_s17, %s2119_s17   ;;  %s1390_s16 = sphi %s1447_s16, %s2118_s16   ;;  %s1386_s15 = sphi %s1445_s15, %s2117_s15   ;;  %s1382_s14 = sphi %s1443_s14, %s2116_s14  }
   0x9   : > { %s1468_s19 = sadd.s32 1, %s1394_s17   ;;  %s28_s20 = sadd.s32 1, %s1390_s16 }
   0xa   : > { %s25_s21 = ssub.s32 %s1394_s17, %s1468_s19  ;;  %p35_p0 = scmp.ne.s32.totalorder %s1390_s16, %s1386_s15 }
   0xb   : > { %p26_p1 = scmp.eq.s32.totalorder %s25_s21, 0  ;;  %p36_p2 = scmp.eq.s32.totalorder %s1394_s17, 0 }
   0xc   : > { %p41_p3 = scmp.ne.s32.totalorder %s1386_s15, %s1382_s14  ;;  %p42_p4 = scmp.eq.s32.totalorder %s1464_s2, 0 }
   0xd   : > { %s1480_s22 = scalar_select %p26_p1, %s1390_s16, %s28_s20  }
   0xe   : > { %p1482_p5 = por %p36_p2, %p35_p0  ;;  %p1488_p6 = por %p42_p4, %p41_p3 }
   0xf   : > { %p107_p7 = scmp.eq.s32.totalorder %s1464_s2, 1  ;;  %p113_p8 = scmp.eq.s32.totalorder %s1146_s18, 1 }
  0x10   : > { %p1147_p9 = scmp.ge.s32.totalorder %s1394_s17, 1  ;;  %p120_p10 = scmp.lt.s32.totalorder %s1394_s17, 3 }
  0x11   : > { %p1495_p11 = por %p107_p7, %p35_p0  ;;  %p1499_p12 = por %p113_p8, %p41_p3 }
  0x12   : > { %p1503_p13 = pnand %p1147_p9, %p120_p10  ;;  %s132_s30 = sshll.u32 %s2095_s1, 4  ;;  %s133_s30 = int_to_ptr.vmem [resolvable:$true] %s132_s30 }
  0x13   : > { %p1188_p2 = scmp.lt.s32.totalorder %s1394_s17, 2  ;;  %s146_s4 = sand.u32 1, %s1390_s16  }
  0x14   : > { %p1175_p1 = pneg %p1503_p13  ;;  %s1150_s6 = sshll.u32 %s146_s4, 6 }
  0x15   : > { %p1519_p3 = pnand %p1188_p2, %p1482_p5  ;;  %s1408_s7 = smov [#allocation8]  }
  0x16   : > { %p1176_p7 = pnand %p1175_p1, %p42_p4  ;;  %s1165_s8 = sshll.u32 %s1394_s17, 6 }
  0x17   : > { %s150_s9 = scalar_lea.vmem [#allocation4], %s1150_s6  ;;  %s155_s13 = scalar_lea.hbm %s2094_s0, %s1165_s8 }
  0x18   : > { %1178 = dma.vmem_to_smem (!%p1176_p7), %s133_s30, 32, %s1408_s7, [#allocation7]  }
  0x19   : > { %s158_s10 = sshll.u32 %s150_s9, 4  ;;  %s156_s18 = sshll.u32 %s155_s13, 4  ;;  %s159_s10 = int_to_ptr.vmem [resolvable:$true] %s158_s10  ;;  %s157_s18 = int_to_ptr.hbm [resolvable:$true] %s156_s18 }
  0x1a   : > { %s147_s20 = scalar_lea.sflag [#allocation5], %s146_s4  ;;  %s1282_s21 = sshra.s32 %s157_s18, 4  ;;  %s1283_s21 = int_to_ptr.hbm [resolvable:$true] %s1282_s21 }
  0x1b   : > { %s1284_s23 = scalar_lea.hbm %s1283_s21, 64  ;;  %p1286_p8 = pneg %p1519_p3 }
  0x1c   : > { %p1285_p5 = scmp.ne.s32.totalorder %s1283_s21, %s1284_s23  ;;  %s1289_s30 = scalar_lea.hbm %s2094_s0, 128 }
  0x1d   : > { %p1290_p1 = scmp.lt.s32.totalorder %s1283_s21, %s2094_s0  ;;  %p1291_p2 = scmp.lt.s32.totalorder %s1289_s30, %s1284_s23 }
  0x1e   : > { %p1287_p9 = pnand %p1286_p8, %p1285_p5 }
  0x1f   : > { %p1292_p7 = por %p1291_p2, %p1290_p1 }
  0x20   : > { %p1288_p10 = pneg %p1287_p9 }
  0x22   : > { %p1293_p0 = pnand %p1292_p7, %p1288_p10 }
  0x24   : > { %1296 = shalt.err (!%p1293_p0)
}
  0x25   : > { %s1409_s4 = smov 128   ;;  %s1410_s8 = smov 8  }
  0x26   : > { %1182 = dma.hbm_to_vmem [thread:$0]  (!%p1519_p3), %s157_s18, 1024, %s159_s10, %s147_s20, %s1409_s4, %s1409_s4, %s1410_s8  }
  0x27   : > { %170 = sbr.rel (%p1503_p13) target bundleno = 447 (0x1bf), region = 32  ;;  %s1540_s9 = sand.u32 (!%p1503_p13), 1, %s1386_s15  }
  0x28   : > { %s1154_s11 = sshll.u32 (!%p1503_p13), %s1540_s9, 6  ;;  %s173_s12 = scalar_lea.sflag (!%p1503_p13), [#allocation5], %s1540_s9 }
  0x29   : > { %s1544_s13 = scalar_lea.vmem (!%p1503_p13), [#allocation4], %s1154_s11 }
  0x2c   : > { %1369 = dma.done.wait (%p1488_p6), %s173_s12, 1024  }
  0x2d   : > { %1371 = vsyncadd (%p1488_p6), %s173_s12, 4294966272 }
  0x2e   : > { %1373 = dma.done.wait (%p42_p4), [#allocation7], 32  }
  0x2f   : > { %1375 = vsyncadd (%p42_p4), [#allocation7], 4294967264 }
  0x30   : > { %187 = sfence }
  0x31   : > { %vm207_vm0 = vcmask 1047680   ;;  %s210_s27 = sld [smem:[#allocation3]]  ;;  %v1411_v0 = vmov 0.0   ;;  %s1554_s5 = scalar_lea.vmem [#allocation9], %s1154_s11 }
  0x32   : > { %206 = vst [vmem:[#allocation2 + $0x10] sm:$0xff] %v1411_v0  ;;  %s1560_s24 = smov 0  }
  0x33   : > { %208 = vst.msk [vmem:[#allocation2] sm:$0xff] %vm207_vm0, %v1411_v0 }
  0x34   : > { %209 = vst.msk [vmem:[#allocation2 + $0x8] sm:$0xff] %vm207_vm0, %v1411_v0 }
  0x37   : > { %v211_v1 = vstv %s210_s27  }
  0x38   : > { %v2108_v2 = vmov %v211_v1 }
  0x39 LB: >> { %s1157_s10 = sshll.u32 %s1406_s24, 4  ;;  %vm226_vm1 = vcmask 130048   ;;  %v235_v4 = vlaneseq  ;;  %v1575_v6 = vld [vmem:[#allocation2 + $0x10] sm:$0xff]  ;;  %s1412_s20 = smov 2   ;;  %s1406_s24 = sphi %s1560_s24, %s218_s24   ;;  %v1402_v1 = vphi %v211_v1, %v2112_v1   ;;  %v1398_v2 = vphi %v2108_v2, %v2111_v2  }
  0x3a   : >> { %s223_s18 = scalar_lea.vmem %s1544_s13, %s1157_s10 [#allocation4]  ;;  %v234_v8 = vrot.slane %v1575_v6, 5  ;;  %s1413_s21 = smov 3   ;;  %v342_v17 = vrot.slane %v1575_v6, 6  ;;  %v448_v22 = vrot.slane %v1575_v6, 7  ;;  %v653_v41 = vrot.slane %v1575_v6, 1 }
  0x3b   : >> { %v224_v3 = vld [vmem:[%s223_s18] sm:$0xff]  ;;  %v225_v5 = vld [vmem:[%s223_s18 + $0x8] sm:$0xff]  ;;  %v1577_v7 = vshrl.u32 %v235_v4, 7  ;;  %s2100_s23 = smov 1   ;;  %s2098_s28 = smov 127  }
  0x3c   : >> { %227 = vst.msk [vmem:[#allocation2] sm:$0xff] %vm226_vm1, %v224_v3  ;;  %s1416_s29 = smov 126   ;;  %s1417_s30 = smov 125  }
  0x3d   : >> { %228 = vst.msk [vmem:[#allocation2 + $0x8] sm:$0xff] %vm226_vm1, %v225_v5  ;;  %vm237_vm2 = vcmp.lt.s32.totalorder %v1577_v7, 3  ;;  %vm343_vm3 = vcmp.lt.s32.totalorder %v1577_v7, 2  ;;  %vm449_vm4 = vcmp.lt.s32.totalorder %v1577_v7, 1  ;;  %s1680_s6 = smul.u32 49, %s1406_s24  ;;  %vm654_vm5 = vcmp.lt.s32.totalorder %v1577_v7, 7 }
  0x3e   : >> { %vm760_vm6 = vcmp.lt.s32.totalorder %v1577_v7, 6  ;;  %vm866_vm7 = vcmp.lt.s32.totalorder %v1577_v7, 5  ;;  %s218_s24 = sadd.s32 1, %s1406_s24  }
  0x3f   : >> { %s262_s7 = sadd.s32 1, %s1680_s6  ;;  %s1696_s8 = sld [smem:[#allocation8 + %s1680_s6]] }
  0x40   : >> { %s1689_s4 = sld [smem:[#allocation8 + %s262_s7]]  ;;  %s277_s11 = sadd.s32 2, %s1680_s6 }
  0x41   : >> { %s1701_s12 = sld [smem:[#allocation8 + %s277_s11]]  ;;  %s286_s27 = sadd.s32 3, %s1680_s6 }
  0x42   : >> { %s1712_s10 = sld [smem:[#allocation8 + %s286_s27]]  ;;  %s316_s18 = sadd.s32 5, %s1680_s6 }
  0x43   : >> { %v1580_v9 = vld [vmem:[#allocation2] sm:$0xff]  ;;  %s301_s7 = sadd.s32 4, %s1680_s6  ;;  %s331_s11 = sadd.s32 6, %s1680_s6 }
  0x44   : >> { %v232_v10 = vrot.slane %v1580_v9, 5  ;;  %v1584_v11 = vld [vmem:[#allocation2 + $0x8] sm:$0xff]  ;;  %v340_v15 = vrot.slane %v1580_v9, 6  ;;  %v446_v20 = vrot.slane %v1580_v9, 7  ;;  %v651_v42 = vrot.slane %v1580_v9, 1  ;;  %s353_s27 = sadd.s32 7, %s1680_s6 }
  0x45   : >> { %v233_v13 = vrot.slane %v1584_v11, 5  ;;  %v341_v16 = vrot.slane %v1584_v11, 6  ;;  %v447_v21 = vrot.slane %v1584_v11, 7  ;;  %v249_v29 = vstv %s1696_s8  ;;  %s1724_s8 = sld [smem:[#allocation8 + %s301_s7]]  ;;  %p215_p4 = scmp.ge.s32.totalorder %s218_s24, 4  }
  0x46   : >> { %v1586_v12 = vsel %vm237_vm2, %v234_v8, %v232_v10  ;;  %v1621_v19 = vsel %vm343_vm3, %v342_v17, %v340_v15  ;;  %v1653_v24 = vsel %vm449_vm4, %v448_v22, %v446_v20  ;;  %v264_v28 = vstv %s1689_s4  ;;  %s1718_s4 = sld [smem:[#allocation8 + %s316_s18]]  ;;  %s1166_s24 = sshll.u32 (%p215_p4), %s1464_s2, 6 }
  0x47   : >> { %256 = vrot.lane.b32.xlu1 %v1586_v12, %s1412_s20  ;;  %241 = vrot.lane.b32.xlu0 %v1586_v12, %s1413_s21  ;;  %v1595_v14 = vsel %vm237_vm2, %v232_v10, %v233_v13  ;;  %v1619_v18 = vsel %vm343_vm3, %v340_v15, %v341_v16  ;;  %v1651_v23 = vsel %vm449_vm4, %v446_v20, %v447_v21  ;;  %v279_v35 = vstv %s1701_s12  ;;  %s332_s12 = sld [smem:[#allocation8 + %s331_s11]]  ;;  %s392_s11 = sadd.s32 10, %s1680_s6 }
  0x48   : >> { %271 = vrot.lane.b32.xlu2 %v1586_v12, %s2100_s23  ;;  %v652_v40 = vrot.slane %v1584_v11, 1  ;;  %v288_v45 = vstv %s1712_s10  ;;  %s368_s10 = sadd.s32 8, %s1680_s6  ;;  %s354_s18 = sld [smem:[#allocation8 + %s353_s27]] }
  0x49   : >> { %v289_v52 = vmul.f32 %v288_v45, %v1586_v12  ;;  %v290_v55 = vmul.f32 %v288_v45, %v1595_v14  ;;  %s1755_s7 = sld [smem:[#allocation8 + %s368_s10]]  ;;  %s422_s27 = sadd.s32 12, %s1680_s6 }
  0x4a   : >> { %v1734_v50 = vsel %vm654_vm5, %v652_v40, %v653_v41  ;;  %v1736_v51 = vsel %vm654_vm5, %v651_v42, %v652_v40  ;;  %s407_s10 = sadd.s32 11, %s1680_s6  ;;  %s1044_s2 = scalar_lea.hbm (%p215_p4), %s2097_s3, %s1166_s24 }
  0x4b   : >> { %v303_v57 = vstv %s1724_s8 }
  0x4c   : >> { %v318_v56 = vstv %s1718_s4  ;;  %s383_s4 = sadd.s32 9, %s1680_s6 }
  0x4d   : >> { %v333_v8 = vstv %s332_s12  ;;  %s384_s8 = sld [smem:[#allocation8 + %s383_s4]] }
  0x4e   : >> { %v355_v22 = vstv %s354_s18  ;;  %s393_s12 = sld [smem:[#allocation8 + %s392_s11]] }
  0x4f   : >> { %258 = vrot.lane.b32.xlu1 %v1595_v14, %s1412_s20  ;;  %243 = vrot.lane.b32.xlu0 %v1595_v14, %s1413_s21  ;;  %s1776_s18 = sld [smem:[#allocation8 + %s407_s10]]  ;;  %s2109_s10 = smov 127  }
  0x50   : >> { %273 = vrot.lane.b32.xlu2 %v1595_v14, %s2100_s23 }
  0x54   : >> { %v394_v45 = vstv %s393_s12 }
  0x57   : >> { %297 = vrot.lane.b32.xlu1 %v1595_v14, %s2098_s28  ;;  %295 = vrot.lane.b32.xlu0 %v1586_v12, %s2098_s28 }
  0x58   : >> { %310 = vrot.lane.b32.xlu2 %v1586_v12, %s1416_s29 }
  0x5f   : >> { %325 = vrot.lane.b32.xlu1 %v1586_v12, %s1417_s30  ;;  %312 = vrot.lane.b32.xlu0 %v1595_v14, %s1416_s29 }
  0x60   : >> { %327 = vrot.lane.b32.xlu2 %v1595_v14, %s1417_s30 }
  0x67   : >> { %349 = vrot.lane.b32.xlu1 %v1619_v18, %s1413_s21  ;;  %347 = vrot.lane.b32.xlu0 %v1621_v19, %s1413_s21 }
  0x68   : >> { %362 = vrot.lane.b32.xlu2 %v1621_v19, %s1412_s20 }
  0x6f   : >> { %377 = vrot.lane.b32.xlu1 %v1621_v19, %s2100_s23  ;;  %364 = vrot.lane.b32.xlu0 %v1619_v18, %s1412_s20 }
  0x70   : >> { %379 = vrot.lane.b32.xlu2 %v1619_v18, %s2100_s23 }
  0x77   : >> { %403 = vrot.lane.b32.xlu1 %v1619_v18, %s2098_s28  ;;  %401 = vrot.lane.b32.xlu0 %v1621_v19, %s2098_s28 }
  0x78   : >> { %416 = vrot.lane.b32.xlu2 %v1621_v19, %s1416_s29 }
  0x7f   : >> { %431 = vrot.lane.b32.xlu1 %v1621_v19, %s1417_s30  ;;  %418 = vrot.lane.b32.xlu0 %v1619_v18, %s1416_s29 }
  0x80   : >> { %433 = vrot.lane.b32.xlu2 %v1619_v18, %s1417_s30 }
  0x87   : >> { %455 = vrot.lane.b32.xlu1 %v1651_v23, %s1413_s21  ;;  %453 = vrot.lane.b32.xlu0 %v1653_v24, %s1413_s21 }
  0x88   : >> { %468 = vrot.lane.b32.xlu2 %v1653_v24, %s1412_s20 }
  0x8f   : >> { %483 = vrot.lane.b32.xlu1 %v1653_v24, %s2100_s23  ;;  %470 = vrot.lane.b32.xlu0 %v1651_v23, %s1412_s20 }
  0x90   : >> { %485 = vrot.lane.b32.xlu2 %v1651_v23, %s2100_s23 }
  0x97   : >> { %509 = vrot.lane.b32.xlu1 %v1651_v23, %s2098_s28  ;;  %507 = vrot.lane.b32.xlu0 %v1653_v24, %s2098_s28 }
  0x98   : >> { %522 = vrot.lane.b32.xlu2 %v1653_v24, %s1416_s29 }
  0x9f   : >> { %537 = vrot.lane.b32.xlu1 %v1653_v24, %s1417_s30  ;;  %524 = vrot.lane.b32.xlu0 %v1651_v23, %s1416_s29 }
  0xa0   : >> { %539 = vrot.lane.b32.xlu2 %v1651_v23, %s1417_s30 }
  0xa2   : >> { %v272_v25 = vpop.permute.xlu2 %271 }
  0xa3   : >> { %v280_v38 = vmul.f32 %v279_v35, %v272_v25  ;;  %v370_v25 = vstv %s1755_s7  ;;  %s437_s7 = sadd.s32 13, %s1680_s6 }
  0xa4   : >> { %s438_s4 = sld [smem:[#allocation8 + %s437_s7]]  ;;  %s498_s7 = sadd.s32 17, %s1680_s6 }
  0xa7   : >> { %554 = vrot.lane.b32.xlu1 %v1584_v11, %s1413_s21  ;;  %552 = vrot.lane.b32.xlu0 %v1580_v9, %s1413_s21 }
  0xa8   : >> { %567 = vrot.lane.b32.xlu2 %v1580_v9, %s1412_s20 }
  0xaa   : >> { %v274_v26 = vpop.permute.xlu2 %273 }
  0xab   : >> { %v281_v54 = vmul.f32 %v279_v35, %v274_v26  ;;  %v385_v35 = vstv %s384_s8  ;;  %s474_s8 = sadd.s32 15, %s1680_s6 }
  0xac   : >> { %s1805_s12 = sld [smem:[#allocation8 + %s474_s8]]  ;;  %s513_s8 = sadd.s32 18, %s1680_s6 }
  0xaf   : >> { %582 = vrot.lane.b32.xlu1 %v1580_v9, %s2100_s23  ;;  %569 = vrot.lane.b32.xlu0 %v1584_v11, %s1412_s20 }
  0xb0   : >> { %584 = vrot.lane.b32.xlu2 %v1584_v11, %s2100_s23 }
  0xb2   : >> { %v311_v27 = vpop.permute.xlu2 %310 }
  0xb3   : >> { %v319_v61 = vmul.f32 %v318_v56, %v311_v27 }
  0xb7   : >> { %608 = vrot.lane.b32.xlu1 %v1584_v11, %s2098_s28  ;;  %606 = vrot.lane.b32.xlu0 %v1580_v9, %s2098_s28 }
  0xb8   : >> { %621 = vrot.lane.b32.xlu2 %v1580_v9, %s1416_s29 }
  0xb9   : >> { %v257_v30 = vpop.permute.xlu1 %256  ;;  %v242_v31 = vpop.permute.xlu0 %241 }
  0xba   : >> { %v265_v32 = vmul.f32 %v264_v28, %v257_v30  ;;  %v250_v33 = vmul.f32 %v249_v29, %v242_v31  ;;  %v328_v34 = vpop.permute.xlu2 %327 }
  0xbb   : >> { %v335_v15 = vmul.f32 %v333_v8, %v328_v34 }
  0xbc   : >> { %v253_v36 = vadd.f32 %v1402_v1, %v250_v33 }
  0xbe   : >> { %v268_v37 = vadd.f32 %v265_v32, %v253_v36  ;;  %v758_v36 = vrot.slane %v1584_v11, 2 }
  0xbf   : >> { %636 = vrot.lane.b32.xlu1 %v1580_v9, %s1417_s30  ;;  %623 = vrot.lane.b32.xlu0 %v1584_v11, %s1416_s29 }
  0xc0   : >> { %v283_v39 = vadd.f32 %v280_v38, %v268_v37  ;;  %638 = vrot.lane.b32.xlu2 %v1584_v11, %s1417_s30  ;;  %v759_v37 = vrot.slane %v1575_v6, 2  ;;  %v757_v38 = vrot.slane %v1580_v9, 2 }
  0xc1   : >> { %v259_v43 = vpop.permute.xlu1 %258  ;;  %v244_v44 = vpop.permute.xlu0 %243 }
  0xc2   : >> { %v266_v46 = vmul.f32 %v264_v28, %v259_v43  ;;  %v251_v47 = vmul.f32 %v249_v29, %v244_v44  ;;  %v363_v48 = vpop.permute.xlu2 %362  ;;  %v292_v62 = vadd.f32 %v289_v52, %v283_v39  ;;  %v395_v52 = vmul.f32 %v394_v45, %v1621_v19 }
  0xc3   : >> { %v371_v30 = vmul.f32 %v370_v25, %v363_v48  ;;  %v1784_v48 = vsel %vm760_vm6, %v758_v36, %v759_v37 }
  0xc4   : >> { %v254_v49 = vadd.f32 %v1398_v2, %v251_v47 }
  0xc6   : >> { %v269_v53 = vadd.f32 %v266_v46, %v254_v49  ;;  %v1786_v49 = vsel %vm760_vm6, %v757_v38, %v758_v36 }
  0xc7   : >> { %660 = vrot.lane.b32.xlu1 %v1734_v50, %s1413_s21  ;;  %658 = vrot.lane.b32.xlu0 %v1736_v51, %s1413_s21 }
  0xc8   : >> { %v284_v58 = vadd.f32 %v281_v54, %v269_v53  ;;  %673 = vrot.lane.b32.xlu2 %v1736_v51, %s1412_s20  ;;  %v396_v53 = vmul.f32 %v394_v45, %v1619_v18 }
  0xc9   : >> { %v298_v59 = vpop.permute.xlu1 %297  ;;  %v296_v60 = vpop.permute.xlu0 %295 }
  0xca   : >> { %v293_v63 = vadd.f32 %v290_v55, %v284_v58  ;;  %v305_v0 = vmul.f32 %v303_v57, %v298_v59  ;;  %v304_v1 = vmul.f32 %v303_v57, %v296_v60  ;;  %v380_v2 = vpop.permute.xlu2 %379 }
  0xcb   : >> { %v387_v43 = vmul.f32 %v385_v35, %v380_v2  ;;  %v439_v2 = vstv %s438_s4  ;;  %s499_s4 = sld [smem:[#allocation8 + %s498_s7]]  ;;  %s2110_s7 = smov 1  }
  0xcc   : >> { %v308_v3 = vadd.f32 %v305_v0, %v293_v63  ;;  %v307_v4 = vadd.f32 %v304_v1, %v292_v62 }
  0xce   : >> { %v322_v5 = vadd.f32 %v319_v61, %v307_v4 }
  0xcf   : >> { %688 = vrot.lane.b32.xlu1 %v1736_v51, %s2100_s23  ;;  %675 = vrot.lane.b32.xlu0 %v1734_v50, %s1412_s20 }
  0xd0   : >> { %690 = vrot.lane.b32.xlu2 %v1734_v50, %s2100_s23 }
  0xd1   : >> { %v326_v10 = vpop.permute.xlu1 %325  ;;  %v313_v12 = vpop.permute.xlu0 %312 }
  0xd2   : >> { %v334_v13 = vmul.f32 %v333_v8, %v326_v10  ;;  %v320_v14 = vmul.f32 %v318_v56, %v313_v12  ;;  %v417_v16 = vpop.permute.xlu2 %416  ;;  %v409_v56 = vstv %s1776_s18 }
  0xd4   : >> { %v337_v17 = vadd.f32 %v334_v13, %v322_v5  ;;  %v323_v20 = vadd.f32 %v320_v14, %v308_v3 }
  0xd6   : >> { %v338_v21 = vadd.f32 %v335_v15, %v323_v20 }
  0xd7   : >> { %714 = vrot.lane.b32.xlu1 %v1734_v50, %s2098_s28  ;;  %712 = vrot.lane.b32.xlu0 %v1736_v51, %s2098_s28  ;;  %s1770_s28 = sld [smem:[#allocation8 + %s422_s27]]  ;;  %s489_s27 = sadd.s32 16, %s1680_s6 }
  0xd8   : >> { %727 = vrot.lane.b32.xlu2 %v1736_v51, %s1416_s29  ;;  %s490_s18 = sld [smem:[#allocation8 + %s489_s27]] }
  0xd9   : >> { %v350_v26 = vpop.permute.xlu1 %349  ;;  %v348_v27 = vpop.permute.xlu0 %347 }
  0xda   : >> { %v357_v28 = vmul.f32 %v355_v22, %v350_v26  ;;  %v356_v29 = vmul.f32 %v355_v22, %v348_v27  ;;  %v434_v31 = vpop.permute.xlu2 %433 }
  0xdb   : >> { %v441_v10 = vmul.f32 %v439_v2, %v434_v31 }
  0xdc   : >> { %v360_v32 = vadd.f32 %v357_v28, %v338_v21  ;;  %v359_v33 = vadd.f32 %v356_v29, %v337_v17  ;;  %v476_v17 = vstv %s1805_s12  ;;  %s543_s12 = sadd.s32 20, %s1680_s6 }
  0xdd   : >> { %v424_v55 = vstv %s1770_s28  ;;  %s459_s28 = sadd.s32 14, %s1680_s6  ;;  %s544_s27 = sld [smem:[#allocation8 + %s543_s12]] }
  0xde   : >> { %v374_v34 = vadd.f32 %v371_v30, %v359_v33  ;;  %v425_v19 = vmul.f32 %v424_v55, %v417_v16  ;;  %s460_s11 = sld [smem:[#allocation8 + %s459_s28]]  ;;  %s528_s28 = sadd.s32 19, %s1680_s6  ;;  %v491_v31 = vstv %s490_s18  ;;  %v865_v33 = vrot.slane %v1575_v6, 3 }
  0xdf   : >> { %742 = vrot.lane.b32.xlu1 %v1736_v51, %s1417_s30  ;;  %729 = vrot.lane.b32.xlu0 %v1734_v50, %s1416_s29  ;;  %s573_s18 = sadd.s32 22, %s1680_s6  ;;  %s642_s12 = sadd.s32 27, %s1680_s6 }
  0xe0   : >> { %744 = vrot.lane.b32.xlu2 %v1734_v50, %s1417_s30 }
  0xe1   : >> { %v378_v39 = vpop.permute.xlu1 %377  ;;  %v365_v40 = vpop.permute.xlu0 %364 }
  0xe2   : >> { %v386_v41 = vmul.f32 %v385_v35, %v378_v39  ;;  %v372_v42 = vmul.f32 %v370_v25, %v365_v40  ;;  %v469_v44 = vpop.permute.xlu2 %468 }
  0xe3   : >> { %v477_v26 = vmul.f32 %v476_v17, %v469_v44 }
  0xe4   : >> { %v389_v46 = vadd.f32 %v386_v41, %v374_v34  ;;  %v375_v47 = vadd.f32 %v372_v42, %v360_v32  ;;  %v461_v16 = vstv %s460_s11  ;;  %s1826_s11 = sld [smem:[#allocation8 + %s513_s8]]  ;;  %v864_v32 = vrot.slane %v1584_v11, 3 }
  0xe5   : >> { %v863_v34 = vrot.slane %v1580_v9, 3  ;;  %v500_v41 = vstv %s499_s4  ;;  %s1857_s4 = sld [smem:[#allocation8 + %s573_s18]] }
  0xe6   : >> { %v390_v54 = vadd.f32 %v387_v43, %v375_v47  ;;  %v398_v59 = vadd.f32 %v395_v52, %v389_v46  ;;  %v1834_v44 = vsel %vm866_vm7, %v864_v32, %v865_v33  ;;  %v502_v46 = vmul.f32 %v500_v41, %v1651_v23  ;;  %s1900_s18 = sld [smem:[#allocation8 + %s642_s12]]  ;;  %s748_s12 = sadd.s32 34, %s1680_s6 }
  0xe7   : >> { %766 = vrot.lane.b32.xlu1 %v1784_v48, %s1413_s21  ;;  %764 = vrot.lane.b32.xlu0 %v1786_v49, %s1413_s21  ;;  %v1836_v6 = vsel %vm866_vm7, %v863_v34, %v864_v32  ;;  %v501_v47 = vmul.f32 %v500_v41, %v1653_v24 }
  0xe8   : >> { %779 = vrot.lane.b32.xlu2 %v1786_v49, %s1412_s20  ;;  %v399_v18 = vadd.f32 %v396_v53, %v390_v54 }
  0xe9   : >> { %v404_v57 = vpop.permute.xlu1 %403  ;;  %v402_v58 = vpop.permute.xlu0 %401 }
  0xea   : >> { %v411_v60 = vmul.f32 %v409_v56, %v404_v57  ;;  %v410_v61 = vmul.f32 %v409_v56, %v402_v58  ;;  %v486_v62 = vpop.permute.xlu2 %485  ;;  %v515_v52 = vstv %s1826_s11  ;;  %s627_s11 = sadd.s32 26, %s1680_s6 }
  0xeb   : >> { %v493_v39 = vmul.f32 %v491_v31, %v486_v62 }
  0xec   : >> { %v414_v63 = vadd.f32 %v411_v60, %v399_v18  ;;  %v413_v0 = vadd.f32 %v410_v61, %v398_v59  ;;  %v545_v60 = vstv %s544_s27  ;;  %s1895_s27 = sld [smem:[#allocation8 + %s627_s11]]  ;;  %s733_s11 = sadd.s32 33, %s1680_s6 }
  0xee   : >> { %v428_v1 = vadd.f32 %v425_v19, %v413_v0 }
  0xef   : >> { %794 = vrot.lane.b32.xlu1 %v1786_v49, %s2100_s23  ;;  %781 = vrot.lane.b32.xlu0 %v1784_v48, %s1412_s20 }
  0xf0   : >> { %796 = vrot.lane.b32.xlu2 %v1784_v48, %s2100_s23  ;;  %s1820_s23 = sld [smem:[#allocation8 + %s528_s28]] }
  0xf1   : >> { %v432_v3 = vpop.permute.xlu1 %431  ;;  %v419_v4 = vpop.permute.xlu0 %418 }
  0xf2   : >> { %v440_v5 = vmul.f32 %v439_v2, %v432_v3  ;;  %v426_v8 = vmul.f32 %v424_v55, %v419_v4  ;;  %v523_v12 = vpop.permute.xlu2 %522 }
  0xf4   : >> { %v443_v13 = vadd.f32 %v440_v5, %v428_v1  ;;  %v429_v14 = vadd.f32 %v426_v8, %v414_v63 }
  0xf6   : >> { %v444_v15 = vadd.f32 %v441_v10, %v429_v14  ;;  %v530_v7 = vstv %s1820_s23  ;;  %s558_s23 = sadd.s32 21, %s1680_s6  ;;  %v575_v10 = vstv %s1857_s4  ;;  %s694_s4 = sadd.s32 30, %s1680_s6 }
  0xf7   : >> { %820 = vrot.lane.b32.xlu1 %v1784_v48, %s2109_s10  ;;  %818 = vrot.lane.b32.xlu0 %v1786_v49, %s2109_s10  ;;  %v531_v55 = vmul.f32 %v530_v7, %v523_v12 }
  0xf8   : >> { %833 = vrot.lane.b32.xlu2 %v1786_v49, %s1416_s29 }
  0xf9   : >> { %v456_v20 = vpop.permute.xlu1 %455  ;;  %v454_v21 = vpop.permute.xlu0 %453 }
  0xfa   : >> { %v463_v22 = vmul.f32 %v461_v16, %v456_v20  ;;  %v462_v25 = vmul.f32 %v461_v16, %v454_v21  ;;  %v540_v27 = vpop.permute.xlu2 %539 }
  0xfb   : >> { %v547_v1 = vmul.f32 %v545_v60, %v540_v27 }
  0xfc   : >> { %v466_v28 = vadd.f32 %v463_v22, %v444_v15  ;;  %v465_v29 = vadd.f32 %v462_v25, %v443_v13 }
  0xfe   : >> { %v480_v30 = vadd.f32 %v477_v26, %v465_v29 }
  0xff   : >> { %848 = vrot.lane.b32.xlu1 %v1786_v49, %s1417_s30  ;;  %835 = vrot.lane.b32.xlu0 %v1784_v48, %s1416_s29 }
 0x100   : >> { %850 = vrot.lane.b32.xlu2 %v1784_v48, %s1417_s30 }
 0x101   : >> { %v484_v35 = vpop.permute.xlu1 %483  ;;  %v471_v36 = vpop.permute.xlu0 %470 }
 0x102   : >> { %v492_v37 = vmul.f32 %v491_v31, %v484_v35  ;;  %v478_v38 = vmul.f32 %v476_v17, %v471_v36  ;;  %v568_v40 = vpop.permute.xlu2 %567 }
 0x103   : >> { %v576_v16 = vmul.f32 %v575_v10, %v568_v40 }
 0x104   : >> { %v495_v42 = vadd.f32 %v492_v37, %v480_v30  ;;  %v481_v43 = vadd.f32 %v478_v38, %v466_v28 }
 0x106   : >> { %v496_v45 = vadd.f32 %v493_v39, %v481_v43  ;;  %v504_v57 = vadd.f32 %v501_v47, %v495_v42 }
 0x107   : >> { %872 = vrot.lane.b32.xlu1 %v1834_v44, %s1413_s21  ;;  %870 = vrot.lane.b32.xlu0 %v1836_v6, %s1413_s21  ;;  %s559_s21 = sld [smem:[#allocation8 + %s558_s23]]  ;;  %s664_s23 = sadd.s32 28, %s1680_s6 }
 0x108   : >> { %885 = vrot.lane.b32.xlu2 %v1836_v6, %s1412_s20  ;;  %v505_v23 = vadd.f32 %v502_v46, %v496_v45 }
 0x109   : >> { %v510_v53 = vpop.permute.xlu1 %509  ;;  %v508_v54 = vpop.permute.xlu0 %507 }
 0x10a   : >> { %v517_v56 = vmul.f32 %v515_v52, %v510_v53  ;;  %v516_v24 = vmul.f32 %v515_v52, %v508_v54  ;;  %v1849_v58 = vpop.permute.xlu2 %584 }
 0x10c   : >> { %v520_v19 = vadd.f32 %v517_v56, %v505_v23  ;;  %v519_v59 = vadd.f32 %v516_v24, %v504_v57  ;;  %v629_v23 = vstv %s1895_s27  ;;  %s1941_s27 = sld [smem:[#allocation8 + %s733_s11]]  ;;  %s839_s11 = sadd.s32 40, %s1680_s6 }
 0x10d   : >> { %v560_v8 = vstv %s559_s21  ;;  %s1907_s21 = sld [smem:[#allocation8 + %s664_s23]]  ;;  %s770_s23 = sadd.s32 35, %s1680_s6 }
 0x10e   : >> { %v534_v18 = vadd.f32 %v531_v55, %v519_v59 }
 0x10f   : >> { %900 = vrot.lane.b32.xlu1 %v1836_v6, %s2110_s7  ;;  %887 = vrot.lane.b32.xlu0 %v1834_v44, %s1412_s20  ;;  %s588_s20 = sadd.s32 23, %s1680_s6 }
 0x110   : >> { %902 = vrot.lane.b32.xlu2 %v1834_v44, %s2110_s7  ;;  %s679_s7 = sadd.s32 29, %s1680_s6 }
 0x111   : >> { %v538_v61 = vpop.permute.xlu1 %537  ;;  %v525_v62 = vpop.permute.xlu0 %524 }
 0x112   : >> { %v546_v63 = vmul.f32 %v545_v60, %v538_v61  ;;  %v532_v0 = vmul.f32 %v530_v7, %v525_v62  ;;  %v1861_v2 = vpop.permute.xlu2 %621 }
 0x113   : >> { %v630_v60 = vmul.f32 %v629_v23, %v1861_v2  ;;  %v666_v62 = vstv %s1907_s21  ;;  %s1950_s21 = sld [smem:[#allocation8 + %s770_s23]]  ;;  %s876_s23 = sadd.s32 42, %s1680_s6 }
 0x114   : >> { %v549_v3 = vadd.f32 %v546_v63, %v534_v18  ;;  %v535_v4 = vadd.f32 %v532_v0, %v520_v19  ;;  %v644_v19 = vstv %s1900_s18  ;;  %s1947_s18 = sld [smem:[#allocation8 + %s748_s12]]  ;;  %s854_s12 = sadd.s32 41, %s1680_s6 }
 0x116   : >> { %v550_v5 = vadd.f32 %v547_v1, %v535_v4 }
 0x117   : >> { %926 = vrot.lane.b32.xlu1 %v1834_v44, %s2109_s10  ;;  %924 = vrot.lane.b32.xlu0 %v1836_v6, %s2109_s10  ;;  %s612_s10 = sadd.s32 25, %s1680_s6 }
 0x118   : >> { %939 = vrot.lane.b32.xlu2 %v1836_v6, %s1416_s29  ;;  %s1891_s8 = sld [smem:[#allocation8 + %s612_s10]]  ;;  %s718_s10 = sadd.s32 32, %s1680_s6 }
 0x119   : >> { %v555_v12 = vpop.permute.xlu1 %554  ;;  %v553_v13 = vpop.permute.xlu0 %552 }
 0x11a   : >> { %v562_v14 = vmul.f32 %v560_v8, %v555_v12  ;;  %v561_v15 = vmul.f32 %v560_v8, %v553_v13  ;;  %v1870_v17 = vpop.permute.xlu2 %638 }
 0x11c   : >> { %v565_v20 = vadd.f32 %v562_v14, %v550_v5  ;;  %v564_v21 = vadd.f32 %v561_v15, %v549_v3 }
 0x11e   : >> { %v579_v22 = vadd.f32 %v576_v16, %v564_v21  ;;  %v614_v47 = vstv %s1891_s8  ;;  %s1933_s8 = sld [smem:[#allocation8 + %s718_s10]]  ;;  %s824_s10 = sadd.s32 39, %s1680_s6 }
 0x11f   : >> { %954 = vrot.lane.b32.xlu1 %v1836_v6, %s1417_s30  ;;  %941 = vrot.lane.b32.xlu0 %v1834_v44, %s1416_s29  ;;  %s589_s29 = sld [smem:[#allocation8 + %s588_s20]] }
 0x120   : >> { %956 = vrot.lane.b32.xlu2 %v1834_v44, %s1417_s30  ;;  %s597_s30 = sadd.s32 24, %s1680_s6  ;;  %s1914_s20 = sld [smem:[#allocation8 + %s679_s7]] }
 0x121   : >> { %v583_v25 = vpop.permute.xlu1 %582  ;;  %v570_v26 = vpop.permute.xlu0 %569  ;;  %s598_s28 = sld [smem:[#allocation8 + %s597_s30]]  ;;  %s703_s30 = sadd.s32 31, %s1680_s6 }
 0x122   : >> { %v1878_v27 = vpop.permute.xlu2 %673  ;;  %v577_v41 = vmul.f32 %v575_v10, %v570_v26  ;;  %v646_v10 = vmul.f32 %v644_v19, %v1870_v17  ;;  %s785_s7 = sadd.s32 36, %s1680_s6 }
 0x124   : >> { %v580_v52 = vadd.f32 %v577_v41, %v565_v20 }
 0x125   : >> { %v590_v39 = vstv %s589_s29  ;;  %s1918_s29 = sld [smem:[#allocation8 + %s694_s4]]  ;;  %s800_s4 = sadd.s32 37, %s1680_s6 }
 0x126   : >> { %v591_v40 = vmul.f32 %v590_v39, %v583_v25  ;;  %v592_v53 = vmul.f32 %v590_v39, %v1849_v58  ;;  %v681_v5 = vstv %s1914_s20  ;;  %s1958_s20 = sld [smem:[#allocation8 + %s785_s7]]  ;;  %s891_s7 = sadd.s32 43, %s1680_s6 }
 0x127   : >> { %v599_v43 = vstv %s598_s28  ;;  %s1930_s28 = sld [smem:[#allocation8 + %s703_s30]]  ;;  %v682_v20 = vmul.f32 %v681_v5, %v1878_v27  ;;  %s809_s30 = sadd.s32 38, %s1680_s6 }
 0x128   : >> { %v594_v7 = vadd.f32 %v591_v40, %v579_v22  ;;  %v600_v54 = vmul.f32 %v599_v43, %v1580_v9  ;;  %v595_v56 = vadd.f32 %v592_v53, %v580_v52  ;;  %v601_v57 = vmul.f32 %v599_v43, %v1584_v11 }
 0x129   : >> { %v609_v28 = vpop.permute.xlu1 %608  ;;  %v607_v29 = vpop.permute.xlu0 %606  ;;  %v735_v40 = vstv %s1941_s27  ;;  %v772_v53 = vstv %s1950_s21  ;;  %s1983_s27 = sld [smem:[#allocation8 + %s839_s11]]  ;;  %s945_s11 = sadd.s32 47, %s1680_s6 }
 0x12a   : >> { %v1880_v30 = vpop.permute.xlu2 %690  ;;  %v615_v55 = vmul.f32 %v614_v47, %v607_v29  ;;  %v603_v24 = vadd.f32 %v600_v54, %v594_v7  ;;  %v616_v58 = vmul.f32 %v614_v47, %v609_v28  ;;  %v604_v11 = vadd.f32 %v601_v57, %v595_v56  ;;  %s1990_s21 = sld [smem:[#allocation8 + %s876_s23]] }
 0x12b   : >> { %v696_v12 = vstv %s1918_s29  ;;  %v750_v7 = vstv %s1947_s18  ;;  %s1962_s29 = sld [smem:[#allocation8 + %s800_s4]]  ;;  %s906_s4 = sadd.s32 44, %s1680_s6 }
 0x12c   : >> { %v618_v18 = vadd.f32 %v615_v55, %v603_v24  ;;  %v619_v1 = vadd.f32 %v616_v58, %v604_v11  ;;  %v787_v24 = vstv %s1958_s20  ;;  %s1987_s18 = sld [smem:[#allocation8 + %s854_s12]] }
 0x12d   : >> { %v705_v26 = vstv %s1930_s28  ;;  %s1973_s28 = sld [smem:[#allocation8 + %s809_s30]]  ;;  %s915_s30 = sadd.s32 45, %s1680_s6 }
 0x12e   : >> { %v633_v3 = vadd.f32 %v630_v60, %v618_v18  ;;  %v707_v43 = vmul.f32 %v705_v26, %v1734_v50  ;;  %s1997_s20 = sld [smem:[#allocation8 + %s891_s7]]  ;;  %s1047_s7 = sshll.u32 (%p215_p4), %s1044_s2, 4  ;;  %s1048_s7 = int_to_ptr.hbm [resolvable:$true] %s1047_s7 }
 0x12f   : >> { %s2015_s12 = sld [smem:[#allocation8 + %s945_s11]] }
 0x131   : >> { %v637_v31 = vpop.permute.xlu1 %636  ;;  %v624_v32 = vpop.permute.xlu0 %623 }
 0x132   : >> { %v1882_v33 = vpop.permute.xlu2 %727  ;;  %v645_v63 = vmul.f32 %v644_v19, %v637_v31  ;;  %v631_v0 = vmul.f32 %v629_v23, %v624_v32  ;;  %v720_v31 = vstv %s1933_s8  ;;  %s1976_s8 = sld [smem:[#allocation8 + %s824_s10]]  ;;  %s930_s10 = sadd.s32 46, %s1680_s6 }
 0x133   : >> { %v736_v52 = vmul.f32 %v735_v40, %v1882_v33 }
 0x134   : >> { %v648_v2 = vadd.f32 %v645_v63, %v633_v3  ;;  %v634_v8 = vadd.f32 %v631_v0, %v619_v1  ;;  %v811_v3 = vstv %s1973_s28  ;;  %s2007_s28 = sld [smem:[#allocation8 + %s915_s30]] }
 0x136   : >> { %v649_v21 = vadd.f32 %v646_v10, %v634_v8 }
 0x139   : >> { %v1884_v34 = vpop.permute.xlu1 %660  ;;  %v659_v35 = vpop.permute.xlu0 %658 }
 0x13a   : >> { %v1888_v36 = vpop.permute.xlu2 %744  ;;  %v667_v4 = vmul.f32 %v666_v62, %v659_v35  ;;  %v668_v15 = vmul.f32 %v666_v62, %v1884_v34  ;;  %v698_v34 = vmul.f32 %v696_v12, %v1880_v30  ;;  %v706_v35 = vmul.f32 %v705_v26, %v1736_v51 }
 0x13c   : >> { %v670_v16 = vadd.f32 %v667_v4, %v648_v2  ;;  %v671_v28 = vadd.f32 %v668_v15, %v649_v21  ;;  %v841_v15 = vstv %s1983_s27  ;;  %s960_s27 = sadd.s32 48, %s1680_s6 }
 0x13d   : >> { %s961_s23 = sld [smem:[#allocation8 + %s960_s27]] }
 0x13e   : >> { %v685_v29 = vadd.f32 %v682_v20, %v670_v16  ;;  %v813_v20 = vmul.f32 %v811_v3, %v1784_v48 }
 0x141   : >> { %v689_v37 = vpop.permute.xlu1 %688  ;;  %v676_v38 = vpop.permute.xlu0 %675 }
 0x142   : >> { %v1898_v42 = vpop.permute.xlu2 %779  ;;  %v697_v22 = vmul.f32 %v696_v12, %v689_v37  ;;  %v683_v25 = vmul.f32 %v681_v5, %v676_v38 }
 0x143   : >> { %v788_v62 = vmul.f32 %v787_v24, %v1898_v42  ;;  %v826_v42 = vstv %s1976_s8  ;;  %s2010_s8 = sld [smem:[#allocation8 + %s930_s10]]  ;;  %s1332_s10 = scalar_lea.hbm (%p215_p4), %s2097_s3, 128 }
 0x144   : >> { %v700_v27 = vadd.f32 %v697_v22, %v685_v29  ;;  %v686_v32 = vadd.f32 %v683_v25, %v671_v28  ;;  %v856_v22 = vstv %s1987_s18 }
 0x146   : >> { %v701_v41 = vadd.f32 %v698_v34, %v686_v32  ;;  %v709_v47 = vadd.f32 %v706_v35, %v700_v27 }
 0x148   : >> { %v710_v54 = vadd.f32 %v707_v43, %v701_v41 }
 0x149   : >> { %v1902_v45 = vpop.permute.xlu1 %714  ;;  %v1904_v46 = vpop.permute.xlu0 %712 }
 0x14a   : >> { %v1926_v61 = vpop.permute.xlu2 %796  ;;  %v721_v39 = vmul.f32 %v720_v31, %v1904_v46  ;;  %v722_v51 = vmul.f32 %v720_v31, %v1902_v45  ;;  %v878_v31 = vstv %s1990_s21  ;;  %s1045_s21 = sshll.u32 (%p215_p4), %s1554_s5, 4  ;;  %s1046_s21 = int_to_ptr.vmem [resolvable:$true] %s1045_s21 }
 0x14c   : >> { %v724_v30 = vadd.f32 %v721_v39, %v709_v47  ;;  %v725_v56 = vadd.f32 %v722_v51, %v710_v54 }
 0x14e   : >> { %v739_v57 = vadd.f32 %v736_v52, %v724_v30 }
 0x151   : >> { %v1920_v59 = vpop.permute.xlu1 %742  ;;  %v1922_v9 = vpop.permute.xlu0 %729 }
 0x152   : >> { %v1944_v17 = vpop.permute.xlu2 %833  ;;  %v751_v55 = vmul.f32 %v750_v7, %v1920_v59  ;;  %v737_v50 = vmul.f32 %v735_v40, %v1922_v9  ;;  %v752_v59 = vmul.f32 %v750_v7, %v1888_v36  ;;  %v802_v9 = vstv %s1962_s29  ;;  %s2001_s29 = sld [smem:[#allocation8 + %s906_s4]]  ;;  %s1326_s4 = sshra.s32 (%p215_p4), %s1048_s7, 4  ;;  %s1327_s4 = int_to_ptr.hbm [resolvable:$true] %s1326_s4 }
 0x153   : >> { %v804_v12 = vmul.f32 %v802_v9, %v1926_v61  ;;  %v842_v28 = vmul.f32 %v841_v15, %v1944_v17  ;;  %p1333_p3 = scmp.lt.s32.totalorder (%p215_p4), %s1327_s4, %s2097_s3 }
 0x154   : >> { %v754_v19 = vadd.f32 %v751_v55, %v739_v57  ;;  %v740_v58 = vadd.f32 %v737_v50, %v725_v56  ;;  %v917_v50 = vstv %s2007_s28 }
 0x156   : >> { %v755_v11 = vadd.f32 %v752_v59, %v740_v58 }
 0x158   : >> { %v908_v41 = vstv %s2001_s29 }
 0x159   : >> { %v767_v13 = vpop.permute.xlu1 %766  ;;  %v765_v14 = vpop.permute.xlu0 %764 }
 0x15a   : >> { %v1967_v46 = vpop.permute.xlu2 %850  ;;  %v773_v33 = vmul.f32 %v772_v53, %v765_v14  ;;  %v774_v18 = vmul.f32 %v772_v53, %v767_v13  ;;  %v812_v13 = vmul.f32 %v811_v3, %v1786_v49  ;;  %v962_v3 = vstv %s961_s23 }
 0x15b   : >> { %v858_v40 = vmul.f32 %v856_v22, %v1967_v46  ;;  %v932_v46 = vstv %s2010_s8 }
 0x15c   : >> { %v776_v60 = vadd.f32 %v773_v33, %v754_v19  ;;  %v777_v5 = vadd.f32 %v774_v18, %v755_v11 }
 0x15e   : >> { %v791_v2 = vadd.f32 %v788_v62, %v776_v60  ;;  %v919_v60 = vmul.f32 %v917_v50, %v1834_v44 }
 0x161   : >> { %v795_v37 = vpop.permute.xlu1 %794  ;;  %v782_v38 = vpop.permute.xlu0 %781 }
 0x162   : >> { %v803_v63 = vmul.f32 %v802_v9, %v795_v37  ;;  %v789_v0 = vmul.f32 %v787_v24, %v782_v38  ;;  %v886_v1 = vpop.permute.xlu2 %885  ;;  %v893_v38 = vstv %s1997_s20  ;;  %v918_v24 = vmul.f32 %v917_v50, %v1836_v6  ;;  %s1328_s20 = scalar_lea.hbm (%p215_p4), %s1327_s4, 64 }
 0x163   : >> { %v894_v30 = vmul.f32 %v893_v38, %v886_v1  ;;  %v947_v9 = vstv %s2015_s12  ;;  %p1329_p6 = scmp.ne.s32.totalorder (%p215_p4), %s1327_s4, %s1328_s20  ;;  %p1334_p5 = scmp.lt.s32.totalorder (%p215_p4), %s1332_s10, %s1328_s20 }
 0x164   : >> { %v806_v8 = vadd.f32 %v803_v63, %v791_v2  ;;  %v792_v10 = vadd.f32 %v789_v0, %v777_v5 }
 0x165   : > { %p1330_p13 = pnand (%p215_p4), %p1329_p6, %p1495_p11  ;;  %p1335_p8 = por (%p215_p4), %p1334_p5, %p1333_p3 }
 0x166   : >> { %v807_v16 = vadd.f32 %v804_v12, %v792_v10  ;;  %v815_v21 = vadd.f32 %v812_v13, %v806_v8 }
 0x167   : > { %p1331_p0 = pneg (%p215_p4), %p1330_p13 }
 0x168   : >> { %v816_v27 = vadd.f32 %v813_v20, %v807_v16 }
 0x169   : >> { %v821_v45 = vpop.permute.xlu1 %820  ;;  %v819_v23 = vpop.permute.xlu0 %818  ;;  %p1336_p9 = pnand (%p215_p4), %p1335_p8, %p1331_p0 }
 0x16a   : >> { %v827_v14 = vmul.f32 %v826_v42, %v819_v23  ;;  %v828_v49 = vmul.f32 %v826_v42, %v821_v45  ;;  %v903_v29 = vpop.permute.xlu2 %902 }
 0x16b   : >> { %v910_v33 = vmul.f32 %v908_v41, %v903_v29 }
 0x16c   : >> { %v830_v61 = vadd.f32 %v827_v14, %v815_v21  ;;  %v831_v48 = vadd.f32 %v828_v49, %v816_v27 }
 0x16e   : >> { %v845_v35 = vadd.f32 %v842_v28, %v830_v61 }
 0x171   : >> { %v849_v36 = vpop.permute.xlu1 %848  ;;  %v836_v4 = vpop.permute.xlu0 %835 }
 0x172   : >> { %v857_v32 = vmul.f32 %v856_v22, %v849_v36  ;;  %v843_v34 = vmul.f32 %v841_v15, %v836_v4  ;;  %v940_v55 = vpop.permute.xlu2 %939 }
 0x173   : >> { %v948_v0 = vmul.f32 %v947_v9, %v940_v55 }
 0x174   : >> { %v860_v39 = vadd.f32 %v857_v32, %v845_v35  ;;  %v846_v17 = vadd.f32 %v843_v34, %v831_v48 }
 0x176   : >> { %v861_v52 = vadd.f32 %v858_v40, %v846_v17  ;;  %v1007_v40 = vld [vmem:[%s1544_s13] sm:$0xff] (%p215_p4) }
 0x179   : >> { %v873_v25 = vpop.permute.xlu1 %872  ;;  %v871_v26 = vpop.permute.xlu0 %870 }
 0x17a   : >> { %v879_v37 = vmul.f32 %v878_v31, %v871_v26  ;;  %v880_v7 = vmul.f32 %v878_v31, %v873_v25  ;;  %v957_v1 = vpop.permute.xlu2 %956 }
 0x17b   : >> { %v964_v2 = vmul.f32 %v962_v3, %v957_v1 }
 0x17c   : >> { %v882_v51 = vadd.f32 %v879_v37, %v860_v39  ;;  %v883_v45 = vadd.f32 %v880_v7, %v861_v52  ;;  %v1008_v7 = vld [vmem:[%s1544_s13 + $0x8] sm:$0xff] (%p215_p4) }
 0x17e   : >> { %v897_v23 = vadd.f32 %v894_v30, %v882_v51  ;;  %v1010_v51 = vld [vmem:[%s1544_s13 + $0x18] sm:$0xff] (%p215_p4) }
 0x181   : >> { %v901_v43 = vpop.permute.xlu1 %900  ;;  %v888_v47 = vpop.permute.xlu0 %887 }
 0x182   : >> { %v909_v53 = vmul.f32 %v908_v41, %v901_v43  ;;  %v895_v54 = vmul.f32 %v893_v38, %v888_v47  ;;  %v1009_v43 = vld [vmem:[%s1544_s13 + $0x10] sm:$0xff] (%p215_p4) }
 0x184   : >> { %v912_v56 = vadd.f32 %v909_v53, %v897_v23  ;;  %v898_v57 = vadd.f32 %v895_v54, %v883_v45  ;;  %v1011_v53 = vld [vmem:[%s1544_s13 + $0x20] sm:$0xff] (%p215_p4)  ;;  %v1012_v45 = vld [vmem:[%s1544_s13 + $0x28] sm:$0xff] (%p215_p4) }
 0x186   : >> { %v913_v18 = vadd.f32 %v910_v33, %v898_v57  ;;  %v921_v62 = vadd.f32 %v918_v24, %v912_v56  ;;  %v1013_v56 = vld [vmem:[%s1544_s13 + $0x30] sm:$0xff] (%p215_p4)  ;;  %v1014_v33 = vld [vmem:[%s1544_s13 + $0x38] sm:$0xff] (%p215_p4)  ;;  %s1033_s13 = scalar_lea.sflag (%p215_p4), [#allocation6], %s1540_s9 }
 0x188   : >> { %v922_v36 = vadd.f32 %v919_v60, %v913_v18 }
 0x189   : >> { %v927_v19 = vpop.permute.xlu1 %926  ;;  %v925_v58 = vpop.permute.xlu0 %924 }
 0x18a   : >> { %v933_v59 = vmul.f32 %v932_v46, %v925_v58  ;;  %v934_v11 = vmul.f32 %v932_v46, %v927_v19 }
 0x18c   : >> { %v936_v63 = vadd.f32 %v933_v59, %v921_v62  ;;  %v937_v42 = vadd.f32 %v934_v11, %v922_v36 }
 0x18e   : >> { %v951_v8 = vadd.f32 %v948_v0, %v936_v63 }
 0x191   : >> { %v955_v4 = vpop.permute.xlu1 %954  ;;  %v942_v5 = vpop.permute.xlu0 %941 }
 0x192   : >> { %v963_v6 = vmul.f32 %v962_v3, %v955_v4  ;;  %v949_v10 = vmul.f32 %v947_v9, %v942_v5 }
 0x194   : >> { %v966_v12 = vadd.f32 %v963_v6, %v951_v8   ;;  %v952_v13 = vadd.f32 %v949_v10, %v937_v42  ;;  %217 = sbr.rel (!%p215_p4) target bundleno = 57 (0x39), region = 90 }
 0x196   : >> { %v967_v14 = vadd.f32 %v964_v2, %v952_v13   ;;  %v2112_v1 = vmov %v966_v12  ;;  %v1158_v44 = vmul.f32 (%p215_p4), -1.442695, %v966_v12 }
 0x198   : >> { %v2111_v2 = vmov %v967_v14  ;;  %v1159_v15 = vmul.f32 (%p215_p4), -1.442695, %v967_v14  ;;  %1259 = vpow2.f32 (%p215_p4), %v1158_v44 }
 0x19a   : > { %1261 = vpow2.f32 %v1159_v15 }
 0x19e   : > { %v1260_v16 = vpop.eup %1259 }
 0x19f   : > { %v975_v21 = vadd.f32 1.0, %v1260_v16 }
 0x1a0   : > { %v1262_v20 = vpop.eup %1261 }
 0x1a1   : > { %v976_v22 = vadd.f32 1.0, %v1262_v20  ;;  %1263 = vrcp.f32 %v975_v21  ;;  %vm982_vm8 = vweird.f32 %v975_v21  ;;  %v988_v61 = vand.u32 2147483648, %v975_v21 }
 0x1a2   : > { %v986_v31 = vand.u32 2147483647, %v975_v21 }
 0x1a3   : > { %1265 = vrcp.f32 %v976_v22  ;;  %v1003_v27 = vand.u32 2147483648, %v976_v22  ;;  %vm997_vm10 = vweird.f32 %v976_v22  ;;  %v1001_v34 = vand.u32 2147483647, %v976_v22 }
 0x1a4   : > { %v989_v37 = vor.u32 1.1754944e-38, %v988_v61  ;;  %vm987_vm13 = vcmp.eq.f32.partialorder %v986_v31, 8.507059e+37 }
 0x1a5   : > { %v1004_v17 = vor.u32 1.1754944e-38, %v1003_v27  ;;  %vm1002_vm15 = vcmp.eq.f32.partialorder %v1001_v34, 8.507059e+37 }
 0x1a7   : > { %v1264_v25 = vpop.eup %1263 }
 0x1a8   : > { %v978_v49 = vmul.f32 %v1264_v25, %v975_v21  ;;  %vm983_vm9 = vweird.f32 %v1264_v25 }
 0x1a9   : > { %v1266_v26 = vpop.eup %1265  ;;  %vm2030_vm12 = vmor %vm982_vm8, %vm983_vm9 }
 0x1aa   : > { %v993_v28 = vmul.f32 %v1266_v26, %v976_v22  ;;  %v979_v29 = vsub.f32 1.0, %v978_v49  ;;  %vm998_vm11 = vweird.f32 %v1266_v26 }
 0x1ab   : > { %vm999_vm14 = vmor %vm997_vm10, %vm998_vm11 }
 0x1ac   : > { %v994_v32 = vsub.f32 1.0, %v993_v28  ;;  %v980_v48 = vmul.f32 %v1264_v25, %v979_v29 }
 0x1ae   : > { %v995_v38 = vmul.f32 %v1266_v26, %v994_v32  ;;  %v981_v39 = vadd.f32 %v1264_v25, %v980_v48 }
 0x1b0   : > { %v996_v41 = vadd.f32 %v1266_v26, %v995_v38  ;;  %v985_v47 = vsel %vm2030_vm12, %v1264_v25, %v981_v39 }
 0x1b1   : > { %v990_v30 = vsel %vm987_vm13, %v989_v37, %v985_v47 }
 0x1b2   : > { %v1000_v52 = vsel %vm999_vm14, %v1266_v26, %v996_v41  ;;  %v1015_v54 = vmul.f32 %v1007_v40, %v990_v30  ;;  %v1017_v50 = vmul.f32 %v1009_v43, %v990_v30  ;;  %v1019_v57 = vmul.f32 %v1011_v53, %v990_v30 }
 0x1b3   : > { %v1005_v55 = vsel %vm1002_vm15, %v1004_v17, %v1000_v52  ;;  %v1021_v19 = vmul.f32 %v1013_v56, %v990_v30 }
 0x1b4   : > { %v1016_v23 = vmul.f32 %v1008_v7, %v1005_v55  ;;  %v1018_v46 = vmul.f32 %v1010_v51, %v1005_v55  ;;  %1024 = vst.msk [vmem:[%s1554_s5] sm:$0xff] %vm226_vm1, %v1015_v54  ;;  %v1020_v24 = vmul.f32 %v1012_v45, %v1005_v55  ;;  %v1022_v58 = vmul.f32 %v1014_v33, %v1005_v55 }
 0x1b5   : > { %1026 = vst.msk [vmem:[%s1554_s5 + $0x10] sm:$0xff] %vm226_vm1, %v1017_v50 }
 0x1b6   : > { %1025 = vst.msk [vmem:[%s1554_s5 + $0x8] sm:$0xff] %vm226_vm1, %v1016_v23 }
 0x1b7   : > { %1027 = vst.msk [vmem:[%s1554_s5 + $0x18] sm:$0xff] %vm226_vm1, %v1018_v46 }
 0x1b8   : > { %1028 = vst.msk [vmem:[%s1554_s5 + $0x20] sm:$0xff] %vm226_vm1, %v1019_v57 }
 0x1b9   : > { %1029 = vst.msk [vmem:[%s1554_s5 + $0x28] sm:$0xff] %vm226_vm1, %v1020_v24 }
 0x1ba   : > { %1030 = vst.msk [vmem:[%s1554_s5 + $0x30] sm:$0xff] %vm226_vm1, %v1021_v19 }
 0x1bb   : > { %1031 = vst.msk [vmem:[%s1554_s5 + $0x38] sm:$0xff] %vm226_vm1, %v1022_v58 }
 0x1bc   : > { %1339 = shalt.err (!%p1336_p9)
}
 0x1bd   : > { %s1418_s9 = smov 128   ;;  %s1419_s5 = smov 8  }
 0x1be   : > { %1173 = dma.vmem_to_hbm [thread:$0]  (%p1495_p11), %s1046_s21, 1024, %s1048_s7, %s1033_s13, %s1418_s9, %s1418_s9, %s1419_s5  }
 0x1bf PF: > { %s1062_s11 = sand.u32 1, %s1382_s14   ;;  %p2115_p10 = scmp.ge.s32.totalorder %s1394_s17, 2 }
 0x1c0   : > { %s1063_s12 = scalar_lea.sflag [#allocation6], %s1062_s11 }
 0x1c1   : > { %p1184_p1 = pnand %p2115_p10, %p1499_p12 }
 0x1c3   : > { %p1185_p2 = pneg %p1184_p1 }
 0x1c5   : > { %1377 = dma.done.wait (%p1185_p2), %s1063_s12, 1024  }
 0x1c6   : > { %1379 = vsyncadd (%p1185_p2), %s1063_s12, 4294966272  ;;  %p18_p7 = scmp.ge.s32.totalorder %s1468_s19, 4   ;;  %s2116_s14 = smov %s1386_s15 }
 0x1c7   : > { %s2117_s15 = smov %s1390_s16  ;;  %s2118_s16 = smov %s1480_s22 }
 0x1c8   : > { %s2119_s17 = smov %s1468_s19  ;;  %20 = sbr.rel (!%p18_p7) target bundleno = 8 (0x8), region = 101 }
 0x1cd   :  { %1069 = vsyncpa [#allocation5], 1 }
 0x1ce   :  { %1071 = vsyncpa [#allocation5 + $0x1], 1 }
 0x1cf   :  { %1072 = vsyncpa [#allocation6], 1 }
 0x1d0   :  { %1074 = vsyncpa [#allocation6 + $0x1], 1 }
 0x1d1   :  { %1075 = vsyncpa [#allocation7], 1 }
 0x1d2   :  { %1077 = vsyncpa [#allocation7 + $0x1], 1 }

</bundles_post_ra>
